<compile_context>
chip_gen: v7x
topology: tpu7x:2x2x1
jax: 0.10.0
libtpu: 0.0.40
codegen_flags: <defaults>
</compile_context>

<pallas_src>
import functools

import jax
import jax.numpy as jnp
from jax.experimental import pallas as pl
from jax.experimental.pallas import tpu as pltpu

LANES = 128


# ------------------------------ helpers --------------------------------------
def _round_up(x, m):
    return ((x + m - 1) // m) * m


def _vmem_capacity_bytes():
    try:
        cap = getattr(pltpu.get_tpu_info(), "vmem_capacity_bytes", None)
        if cap:
            return int(cap)
    except Exception:
        pass
    return 64 * 1024 * 1024  # conservative default (v7x per-core VMEM)


def _choose_tiling(n, feat_pad, vmem_cap):
    """Pick (row_tile, k_tile, n_pad, vmem_limit_bytes).

    Budget (~3/4 of VMEM) counts the resident X / stacked weights / bias / inv-degree, the
    double-buffered int8 adjacency tile, the double-buffered output tile and the f32
    aggregation accumulator — all evaluated at the candidate's actual n_pad.
    """
    budget = vmem_cap * 3 // 4
    n128 = _round_up(n, LANES)
    tm_candidates = [t for t in (1024, 512, 256, 128) if t <= n128]
    # v7x megacore: prefer >=4 row tiles so the "parallel" axis feeds both TensorCores.
    preferred = [t for t in tm_candidates if _round_up(n, t) // t >= 4] or tm_candidates

    def usage(tm, tk, n_pad):
        fixed = (n_pad * feat_pad * 2            # resident X (bf16, single copy)
                 + 2 * feat_pad * feat_pad * 2   # stacked [Wl; Wr] (bf16)
                 + feat_pad * 4                  # bias (f32)
                 + n_pad * 4)                    # inverse degree (f32)
        per_step = (2 * tm * tk                  # int8 adjacency tile, double buffered
                    + 2 * tm * feat_pad * 4      # output tile, double buffered (f32 worst case)
                    + tm * feat_pad * 4)         # f32 aggregation accumulator scratch
        return fixed + per_step

    def limit_for(est):
        return int(min(vmem_cap * 7 // 8, max(est + (8 << 20), 32 << 20)))

    for tm in preferred:
        n_pad = _round_up(n, tm)
        tks = [n_pad] + [t for t in (2048, 1024, 512, 256, 128)
                         if t < n_pad and n_pad % t == 0]
        for tk in tks:
            est = usage(tm, tk, n_pad)
            if est <= budget:
                return tm, tk, n_pad, limit_for(est)

    # Last resort: smallest tiles (may exceed the soft budget; the estimate still sets the limit).
    tm = tk = 128
    n_pad = _round_up(n, 128)
    return tm, tk, n_pad, limit_for(usage(tm, tk, n_pad))


def _stack_pad_weights(wl, wr, in_pad, out_pad):
    """Pad (in,out) weights to (in_pad,out_pad) and stack [Wl; Wr] -> (2*in_pad, out_pad) bf16."""
    wl_p = jnp.pad(wl, ((0, in_pad - wl.shape[0]), (0, out_pad - wl.shape[1])))
    wr_p = jnp.pad(wr, ((0, in_pad - wr.shape[0]), (0, out_pad - wr.shape[1])))
    return jnp.concatenate([wl_p, wr_p], axis=0).astype(jnp.bfloat16)


# ----------------------------- Pallas kernel --------------------------------
def sage_conv_kernel(a_ref, invd_ref, x_ref, w_ref, b_ref, o_ref, acc_ref, *,
                     row_tile, k_tile, apply_relu):
    """One SAGEConv (mean aggr, lin_l + lin_r, bias, L2-normalize) for one row tile.

    a_ref    : (row_tile, k_tile) int8   streamed adjacency edge-count tile
    invd_ref : (N_pad, 1)         f32    exact inverse in-degree (VMEM resident)
    x_ref    : (N_pad, FP)        bf16   full node features (VMEM resident)
    w_ref    : (2*FP, HP)         bf16   stacked [Wl; Wr] (VMEM resident)
    b_ref    : (1, HP)            f32    lin_l bias (VMEM resident)
    o_ref    : (row_tile, HP)            output rows for this tile (lane dense)
    acc_ref  : (row_tile, FP)     f32    aggregation accumulator scratch
    """
    i = pl.program_id(0)
    k = pl.program_id(1)

    @pl.when(k == 0)
    def _():
        acc_ref[...] = jnp.zeros_like(acc_ref)

    # int8 -> bf16 on the VPU (kernel is DMA-bound; VPU has slack), then MXU matmul
    # for this (row, contraction) chunk of   sum_j A[i, j] * X[j].
    a = a_ref[...].astype(jnp.bfloat16)
    k_start = pl.multiple_of(k * k_tile, k_tile)
    acc_ref[...] += jnp.dot(a, x_ref[pl.ds(k_start, k_tile), :],
                            preferred_element_type=jnp.float32)

    @pl.when(k == pl.num_programs(1) - 1)
    def _():
        fp = x_ref.shape[1]
        row = pl.multiple_of(i * row_tile, row_tile)

        # Exact mean normalization: scale the summed aggregation by the f32 1/deg column.
        agg = acc_ref[...] * invd_ref[pl.ds(row, row_tile), :]
        x_self = x_ref[pl.ds(row, row_tile), :]

        # lin_l + lin_r via two matmuls on static views of the stacked weights
        # (no concatenated (TM, 2*FP) buffer materialized in the hot loop).
        h = jnp.dot(agg.astype(jnp.bfloat16), w_ref[:fp, :],
                    preferred_element_type=jnp.float32)
        h = h + jnp.dot(x_self, w_ref[fp:, :], preferred_element_type=jnp.float32)
        h = h + b_ref[...]

        # F.normalize(p=2, dim=-1, eps=1e-12) via rsqrt (EUP) instead of sqrt + divide.
        ss = jnp.sum(h * h, axis=-1, keepdims=True)
        h = h * jax.lax.rsqrt(jnp.maximum(ss, 1e-24))

        if apply_relu:  # fused first op of the transition block
            h = jnp.maximum(h, 0.0)

        o_ref[...] = h.astype(o_ref.dtype)


# ------------------------------ pallas_call wrapper --------------------------
def _sage_conv(adj_i8, inv_deg, x_p, w_stacked, bias_p, *, row_tile, k_tile,
               vmem_limit, apply_relu, out_dtype):
    n_pad = adj_i8.shape[0]
    fp = x_p.shape[1]
    hp = w_stacked.shape[1]
    grid = (n_pad // row_tile, n_pad // k_tile)

    flops = 2 * n_pad * n_pad * fp + 2 * n_pad * (2 * fp) * hp
    bytes_accessed = (adj_i8.size                       # int8 adjacency stream (dominant)
                      + x_p.size * 2 + w_stacked.size * 2
                      + inv_deg.size * 4 + bias_p.size * 4
                      + n_pad * hp * jnp.dtype(out_dtype).itemsize)

    kernel = functools.partial(sage_conv_kernel, row_tile=row_tile, k_tile=k_tile,
                               apply_relu=apply_relu)
    vmem = pltpu.MemorySpace.VMEM

    return pl.pallas_call(
        kernel,
        out_shape=jax.ShapeDtypeStruct((n_pad, hp), out_dtype),
        grid=grid,
        in_specs=[
            # O(N^2) int8 adjacency: streamed one (row, contraction) tile per step (double-buffered).
            pl.BlockSpec((row_tile, k_tile), lambda i, k: (i, k)),
            # Constant operands: whole-array VMEM residents (single copy, no double-buffering).
            pl.BlockSpec(memory_space=vmem),   # inverse degree (N_pad, 1) f32
            pl.BlockSpec(memory_space=vmem),   # node features  (N_pad, FP) bf16
            pl.BlockSpec(memory_space=vmem),   # stacked [Wl;Wr] (2*FP, HP) bf16
            pl.BlockSpec(memory_space=vmem),   # bias (1, HP) f32
        ],
        out_specs=pl.BlockSpec((row_tile, hp), lambda i, k: (i, 0)),
        scratch_shapes=[pltpu.VMEM((row_tile, fp), jnp.float32)],
        compiler_params=pltpu.CompilerParams(
            dimension_semantics=("parallel", "arbitrary"),
            vmem_limit_bytes=int(vmem_limit),
        ),
        cost_estimate=pl.CostEstimate(
            flops=int(flops), transcendentals=int(n_pad),
            bytes_accessed=int(bytes_accessed)),
    )(adj_i8, inv_deg, x_p, w_stacked, bias_p)


# ------------------------------ graph prep (once per graph) -------------------
def build_graph_inputs(edge_index, num_nodes, n_pad):
    """Precompute once per graph (hoisted out of the jitted forward):
    int8 edge-count adjacency A[i, j] = #edges j->i (padded) and the exact f32 inverse
    in-degree column that turns the int8 matmul into the mean aggregation."""
    src, dst = edge_index[0], edge_index[1]
    counts = jnp.zeros((num_nodes, num_nodes), jnp.float32).at[dst, src].add(1.0)
    deg = jnp.sum(counts, axis=1, keepdims=True)
    inv_deg = 1.0 / jnp.clip(deg, 1.0, None)
    # TODO(synk): int8 counts assume < 128 parallel edges between any (src, dst) pair.
    adj_i8 = jnp.pad(counts, ((0, n_pad - num_nodes), (0, n_pad - num_nodes))).astype(jnp.int8)
    inv_deg_p = jnp.pad(inv_deg, ((0, n_pad - num_nodes), (0, 0))).astype(jnp.float32)
    return adj_i8, inv_deg_p


# ------------------------------ full forward ----------------------------------
def make_sage_encoder_forward(num_nodes, num_features, hidden):
    """Build a jitted forward with static, generation-aware tiling. Returns (forward, n_pad)."""
    fp = _round_up(num_features, LANES)
    hp = _round_up(hidden, LANES)
    feat_pad = max(fp, hp)
    tm, tk, n_pad, vmem_limit = _choose_tiling(num_nodes, feat_pad, _vmem_capacity_bytes())

    conv = functools.partial(_sage_conv, row_tile=tm, k_tile=tk, vmem_limit=vmem_limit)

    @jax.jit
    def forward(adj_i8, inv_deg, x, wl1, wr1, b1, gamma, beta, wl2, wr2, b2):
        n, f = x.shape
        x_p = jnp.pad(x, ((0, n_pad - n), (0, fp - f))).astype(jnp.bfloat16)

        # Stacked / padded parameters (tiny; built once per forward).
        w1s = _stack_pad_weights(wl1, wr1, fp, hp)
        b1p = jnp.pad(b1, ((0, 0), (0, hp - hidden))).astype(jnp.float32)
        w2s = _stack_pad_weights(wl2, wr2, hp, hp)
        b2p = jnp.pad(b2, ((0, 0), (0, hp - hidden))).astype(jnp.float32)

        # ---- SAGEConv 1 (+ fused ReLU); bf16 output halves the h1 writeback ----
        h1 = conv(adj_i8, inv_deg, x_p, w1s, b1p, apply_relu=True, out_dtype=jnp.bfloat16)

        # ---- BatchNorm1d (batch statistics, biased var — PyTorch BN training math),
        #      computed in f32 directly on the padded bf16 h1 with a row mask so there is
        #      no slice -> BN -> pad round-trip before conv2. Padded rows never reach the
        #      final output (A has zero columns for padded nodes; output rows are sliced). ----
        row_mask = (jax.lax.broadcasted_iota(jnp.int32, (n_pad, 1), 0) < n).astype(jnp.float32)
        h1f = h1.astype(jnp.float32)
        mu = jnp.sum(h1f * row_mask, axis=0, keepdims=True) / n
        var = jnp.sum(jnp.square(h1f - mu) * row_mask, axis=0, keepdims=True) / n
        gamma_p = jnp.pad(gamma, ((0, 0), (0, hp - hidden)), constant_values=1.0)
        beta_p = jnp.pad(beta, ((0, 0), (0, hp - hidden)))
        h1_bn = ((h1f - mu) * jax.lax.rsqrt(var + 1e-5) * gamma_p + beta_p).astype(jnp.bfloat16)
        # TODO(synk): Dropout is stochastic in training; implemented as identity (eval semantics).
        # TODO(synk): BatchNorm running_mean/var are not tracked (batch-stats forward only).

        # ---- SAGEConv 2 ----
        h2 = conv(adj_i8, inv_deg, h1_bn, w2s, b2p, apply_relu=False, out_dtype=jnp.float32)
        return h2[:n, :hidden]

    return forward, n_pad


# ------------------------------ param setup -----------------------------------
def init_params(key, num_features, hidden):
    """Deterministic parameter init (Kaiming-uniform-ish scale like torch Linear)."""
    ks = jax.random.split(key, 6)

    def lin(k, fan_in, fan_out):
        bound = 1.0 / jnp.sqrt(jnp.float32(fan_in))
        return jax.random.uniform(k, (fan_in, fan_out), jnp.float32, -bound, bound)

    wl1 = lin(ks[0], num_features, hidden)          # conv1.lin_l weight (in, out)
    wr1 = lin(ks[1], num_features, hidden)          # conv1.lin_r weight
    b1 = jax.random.uniform(ks[2], (1, hidden), jnp.float32,
                            -1.0 / jnp.sqrt(jnp.float32(num_features)),
                            1.0 / jnp.sqrt(jnp.float32(num_features)))
    wl2 = lin(ks[3], hidden, hidden)                # conv2.lin_l weight
    wr2 = lin(ks[4], hidden, hidden)                # conv2.lin_r weight
    b2 = jax.random.uniform(ks[5], (1, hidden), jnp.float32,
                            -1.0 / jnp.sqrt(jnp.float32(hidden)),
                            1.0 / jnp.sqrt(jnp.float32(hidden)))
    gamma = jnp.ones((1, hidden), jnp.float32)      # BatchNorm1d weight
    beta = jnp.zeros((1, hidden), jnp.float32)      # BatchNorm1d bias
    return wl1, wr1, b1, gamma, beta, wl2, wr2, b2


if __name__ == "__main__":
    key = jax.random.PRNGKey(0)
    k_x, k_e, k_p = jax.random.split(key, 3)

    num_nodes = 64
    num_features = 16
    hidden = 32
    num_edges = 256

    x = jax.random.normal(k_x, (num_nodes, num_features), jnp.float32)
    edge_index = jax.random.randint(k_e, (2, num_edges), 0, num_nodes, jnp.int32)

    params = init_params(k_p, num_features, hidden)

    forward, n_pad = make_sage_encoder_forward(num_nodes, num_features, hidden)
    # Graph structure is precomputed ONCE (not per forward): int8 adjacency + exact f32 1/deg.
    adj_i8, inv_deg = build_graph_inputs(edge_index, num_nodes, n_pad)
    (adj_i8, inv_deg) = jax.block_until_ready((adj_i8, inv_deg))

    h = forward(adj_i8, inv_deg, x, *params)
    jax.block_until_ready(h)
    assert h.shape == (num_nodes, hidden) and h.dtype == jnp.float32
    print("KERNEL_OK")
</pallas_src>

<mosaic_0001>
module attributes {stable_mosaic.version = 11 : i64} {
  func.func @sage_conv_kernel(%arg0: i32, %arg1: i32, %arg2: memref<128x128xi8, #tpu.memory_space<vmem>>, %arg3: memref<128x1xf32, #tpu.memory_space<vmem>>, %arg4: memref<128x128xbf16, #tpu.memory_space<vmem>>, %arg5: memref<256x128xbf16, #tpu.memory_space<vmem>>, %arg6: memref<1x128xf32, #tpu.memory_space<vmem>>, %arg7: memref<128x128xbf16, #tpu.memory_space<vmem>>, %arg8: memref<128x128xf32, #tpu.memory_space<vmem>>) attributes {dimension_semantics = [#tpu.dimension_semantics<parallel>, #tpu.dimension_semantics<arbitrary>], iteration_bounds = array<i64: 1, 1>, scalar_prefetch = 0 : i64, scratch_operands = 1 : i64, tpu.core_type = #tpu.core_type<tc>, window_params = [{transform_indices = @transform_0, window_bounds = array<i64: 128, 128>}, {pipeline_mode = #tpu.pipeline_mode<synchronous>, transform_indices = @transform_1, window_bounds = array<i64: 128, 1>}, {pipeline_mode = #tpu.pipeline_mode<synchronous>, transform_indices = @transform_2, window_bounds = array<i64: 128, 128>}, {pipeline_mode = #tpu.pipeline_mode<synchronous>, transform_indices = @transform_3, window_bounds = array<i64: 256, 128>}, {pipeline_mode = #tpu.pipeline_mode<synchronous>, transform_indices = @transform_4, window_bounds = array<i64: 1, 128>}, {transform_indices = @transform_5, window_bounds = array<i64: 128, 128>}]} {
    %c0_i32 = arith.constant 0 : i32
    %0 = arith.cmpi eq, %arg1, %c0_i32 : i32
    %1 = arith.extui %0 : i1 to i32
    %c0_i32_0 = arith.constant 0 : i32
    %2 = arith.cmpi ne, %1, %c0_i32_0 : i32
    scf.if %2 {
      %cst_9 = arith.constant 0.000000e+00 : f32
      %16 = vector.broadcast %cst_9 : f32 to vector<128x128xf32>
      %c0_10 = arith.constant 0 : index
      %c0_11 = arith.constant 0 : index
      %17 = vector.load %arg8[%c0_10, %c0_11] : memref<128x128xf32, #tpu.memory_space<vmem>>, vector<128x128xf32>
      tpu.vector_store %arg8[%c0_10, %c0_11], %16 {strides = array<i32>} : memref<128x128xf32, #tpu.memory_space<vmem>>, vector<128x128xf32>,
    } else {
    }
    %c0 = arith.constant 0 : index
    %c0_1 = arith.constant 0 : index
    %3 = vector.load %arg2[%c0, %c0_1] : memref<128x128xi8, #tpu.memory_space<vmem>>, vector<128x128xi8>
    %4 = arith.sitofp %3 : vector<128x128xi8> to vector<128x128xbf16>
    %c128_i32 = arith.constant 128 : i32
    %5 = arith.muli %arg1, %c128_i32 : i32
    %6 = tpu.assume_multiple %5, 128 : i32
    %c0_2 = arith.constant 0 : index
    %c0_3 = arith.constant 0 : index
    %7 = vector.load %arg8[%c0_2, %c0_3] : memref<128x128xf32, #tpu.memory_space<vmem>>, vector<128x128xf32>
    %8 = arith.index_cast %6 : i32 to index
    %c0_4 = arith.constant 0 : index
    %9 = vector.load %arg4[%8, %c0_4] : memref<128x128xbf16, #tpu.memory_space<vmem>>, vector<128x128xbf16>
    %cst = arith.constant dense<0.000000e+00> : vector<128x128xf32>
    %10 = tpu.matmul %4, %9, %cst {dimension_numbers = #tpu.dot_dimension_numbers<[1], [0], [0], [1], [0, 0, 1, 1], [], []>} : vector<128x128xbf16>, vector<128x128xbf16>, vector<128x128xf32> -> vector<128x128xf32>
    %11 = arith.addf %7, %10 : vector<128x128xf32>
    %c0_5 = arith.constant 0 : index
    %c0_6 = arith.constant 0 : index
    %12 = vector.load %arg8[%c0_5, %c0_6] : memref<128x128xf32, #tpu.memory_space<vmem>>, vector<128x128xf32>
    tpu.vector_store %arg8[%c0_5, %c0_6], %11 {strides = array<i32>} : memref<128x128xf32, #tpu.memory_space<vmem>>, vector<128x128xf32>,
    %c0_i32_7 = arith.constant 0 : i32
    %13 = arith.cmpi eq, %arg1, %c0_i32_7 : i32
    %14 = arith.extui %13 : i1 to i32
    %c0_i32_8 = arith.constant 0 : i32
    %15 = arith.cmpi ne, %14, %c0_i32_8 : i32
    scf.if %15 {
      %c128_i32_9 = arith.constant 128 : i32
      %16 = arith.muli %arg0, %c128_i32_9 : i32
      %17 = tpu.assume_multiple %16, 128 : i32
      %c0_10 = arith.constant 0 : index
      %c0_11 = arith.constant 0 : index
      %18 = vector.load %arg8[%c0_10, %c0_11] : memref<128x128xf32, #tpu.memory_space<vmem>>, vector<128x128xf32>
      %19 = arith.index_cast %17 : i32 to index
      %c0_12 = arith.constant 0 : index
      %20 = vector.load %arg3[%19, %c0_12] : memref<128x1xf32, #tpu.memory_space<vmem>>, vector<128x1xf32>
      %21 = vector.broadcast %20 : vector<128x1xf32> to vector<128x128xf32>
      %22 = arith.mulf %18, %21 : vector<128x128xf32>
      %23 = arith.index_cast %17 : i32 to index
      %c0_13 = arith.constant 0 : index
      %24 = vector.load %arg4[%23, %c0_13] : memref<128x128xbf16, #tpu.memory_space<vmem>>, vector<128x128xbf16>
      %25 = arith.truncf %22 : vector<128x128xf32> to vector<128x128xbf16>
      %c0_14 = arith.constant 0 : index
      %c0_15 = arith.constant 0 : index
      %26 = vector.load %arg5[%c0_14, %c0_15] : memref<256x128xbf16, #tpu.memory_space<vmem>>, vector<128x128xbf16>
      %cst_16 = arith.constant dense<0.000000e+00> : vector<128x128xf32>
      %27 = tpu.matmul %25, %26, %cst_16 {dimension_numbers = #tpu.dot_dimension_numbers<[1], [0], [0], [1], [0, 0, 1, 1], [], []>} : vector<128x128xbf16>, vector<128x128xbf16>, vector<128x128xf32> -> vector<128x128xf32>
      %c128 = arith.constant 128 : index
      %c0_17 = arith.constant 0 : index
      %28 = vector.load %arg5[%c128, %c0_17] : memref<256x128xbf16, #tpu.memory_space<vmem>>, vector<128x128xbf16>
      %cst_18 = arith.constant dense<0.000000e+00> : vector<128x128xf32>
      %29 = tpu.matmul %24, %28, %cst_18 {dimension_numbers = #tpu.dot_dimension_numbers<[1], [0], [0], [1], [0, 0, 1, 1], [], []>} : vector<128x128xbf16>, vector<128x128xbf16>, vector<128x128xf32> -> vector<128x128xf32>
      %30 = arith.addf %27, %29 : vector<128x128xf32>
      %c0_19 = arith.constant 0 : index
      %c0_20 = arith.constant 0 : index
      %31 = vector.load %arg6[%c0_19, %c0_20] : memref<1x128xf32, #tpu.memory_space<vmem>>, vector<1x128xf32>
      %32 = vector.broadcast %31 : vector<1x128xf32> to vector<128x128xf32>
      %33 = arith.addf %30, %32 : vector<128x128xf32>
      %34 = arith.mulf %33, %33 : vector<128x128xf32>
      %cst_21 = arith.constant dense<0.000000e+00> : vector<128xf32>
      %35 = vector.multi_reduction <add>, %34, %cst_21 [1] : vector<128x128xf32> to vector<128xf32>
      %36 = vector.shape_cast %35 : vector<128xf32> to vector<128x1xf32>
      %cst_22 = arith.constant 1.000000e-24 : f32
      %37 = vector.broadcast %cst_22 : f32 to vector<128x1xf32>
      %38 = arith.maximumf %36, %37 : vector<128x1xf32>
      %39 = math.rsqrt %38 : vector<128x1xf32>
      %40 = vector.broadcast %39 : vector<128x1xf32> to vector<128x128xf32>
      %41 = arith.mulf %33, %40 : vector<128x128xf32>
      %cst_23 = arith.constant 0.000000e+00 : f32
      %42 = vector.broadcast %cst_23 : f32 to vector<128x128xf32>
      %43 = arith.maximumf %41, %42 : vector<128x128xf32>
      %44 = arith.truncf %43 : vector<128x128xf32> to vector<128x128xbf16>
      %c0_24 = arith.constant 0 : index
      %c0_25 = arith.constant 0 : index
      %45 = vector.load %arg7[%c0_24, %c0_25] : memref<128x128xbf16, #tpu.memory_space<vmem>>, vector<128x128xbf16>
      tpu.vector_store %arg7[%c0_24, %c0_25], %44 {strides = array<i32>} : memref<128x128xbf16, #tpu.memory_space<vmem>>, vector<128x128xbf16>,
    } else {
    }
    return
  }
  func.func @transform_0(%arg0: i32, %arg1: i32) -> (i32, i32) {
    %c0_i32 = arith.constant 0 : i32
    return %arg0, %arg1 : i32, i32
  }
  func.func @transform_1(%arg0: i32, %arg1: i32) -> (i32, i32) {
    %c0_i32 = arith.constant 0 : i32
    %c0_i32_0 = arith.constant 0 : i32
    %c0_i32_1 = arith.constant 0 : i32
    return %c0_i32, %c0_i32_0 : i32, i32
  }
  func.func @transform_2(%arg0: i32, %arg1: i32) -> (i32, i32) {
    %c0_i32 = arith.constant 0 : i32
    %c0_i32_0 = arith.constant 0 : i32
    %c0_i32_1 = arith.constant 0 : i32
    return %c0_i32, %c0_i32_0 : i32, i32
  }
  func.func @transform_3(%arg0: i32, %arg1: i32) -> (i32, i32) {
    %c0_i32 = arith.constant 0 : i32
    %c0_i32_0 = arith.constant 0 : i32
    %c0_i32_1 = arith.constant 0 : i32
    return %c0_i32, %c0_i32_0 : i32, i32
  }
  func.func @transform_4(%arg0: i32, %arg1: i32) -> (i32, i32) {
    %c0_i32 = arith.constant 0 : i32
    %c0_i32_0 = arith.constant 0 : i32
    %c0_i32_1 = arith.constant 0 : i32
    return %c0_i32, %c0_i32_0 : i32, i32
  }
  func.func @transform_5(%arg0: i32, %arg1: i32) -> (i32, i32) {
    %c0_i32 = arith.constant 0 : i32
    %c0_i32_0 = arith.constant 0 : i32
    return %arg0, %c0_i32 : i32, i32
  }
}

module attributes {stable_mosaic.version = 11 : i64} {
  func.func @sage_conv_kernel(%arg0: i32, %arg1: i32, %arg2: memref<128x128xi8, #tpu.memory_space<vmem>>, %arg3: memref<128x1xf32, #tpu.memory_space<vmem>>, %arg4: memref<128x128xbf16, #tpu.memory_space<vmem>>, %arg5: memref<256x128xbf16, #tpu.memory_space<vmem>>, %arg6: memref<1x128xf32, #tpu.memory_space<vmem>>, %arg7: memref<128x128xf32, #tpu.memory_space<vmem>>, %arg8: memref<128x128xf32, #tpu.memory_space<vmem>>) attributes {dimension_semantics = [#tpu.dimension_semantics<parallel>, #tpu.dimension_semantics<arbitrary>], iteration_bounds = array<i64: 1, 1>, scalar_prefetch = 0 : i64, scratch_operands = 1 : i64, tpu.core_type = #tpu.core_type<tc>, window_params = [{transform_indices = @transform_0, window_bounds = array<i64: 128, 128>}, {pipeline_mode = #tpu.pipeline_mode<synchronous>, transform_indices = @transform_1, window_bounds = array<i64: 128, 1>}, {pipeline_mode = #tpu.pipeline_mode<synchronous>, transform_indices = @transform_2, window_bounds = array<i64: 128, 128>}, {pipeline_mode = #tpu.pipeline_mode<synchronous>, transform_indices = @transform_3, window_bounds = array<i64: 256, 128>}, {pipeline_mode = #tpu.pipeline_mode<synchronous>, transform_indices = @transform_4, window_bounds = array<i64: 1, 128>}, {transform_indices = @transform_5, window_bounds = array<i64: 128, 128>}]} {
    %c0_i32 = arith.constant 0 : i32
    %0 = arith.cmpi eq, %arg1, %c0_i32 : i32
    %1 = arith.extui %0 : i1 to i32
    %c0_i32_0 = arith.constant 0 : i32
    %2 = arith.cmpi ne, %1, %c0_i32_0 : i32
    scf.if %2 {
      %cst_9 = arith.constant 0.000000e+00 : f32
      %16 = vector.broadcast %cst_9 : f32 to vector<128x128xf32>
      %c0_10 = arith.constant 0 : index
      %c0_11 = arith.constant 0 : index
      %17 = vector.load %arg8[%c0_10, %c0_11] : memref<128x128xf32, #tpu.memory_space<vmem>>, vector<128x128xf32>
      tpu.vector_store %arg8[%c0_10, %c0_11], %16 {strides = array<i32>} : memref<128x128xf32, #tpu.memory_space<vmem>>, vector<128x128xf32>,
    } else {
    }
    %c0 = arith.constant 0 : index
    %c0_1 = arith.constant 0 : index
    %3 = vector.load %arg2[%c0, %c0_1] : memref<128x128xi8, #tpu.memory_space<vmem>>, vector<128x128xi8>
    %4 = arith.sitofp %3 : vector<128x128xi8> to vector<128x128xbf16>
    %c128_i32 = arith.constant 128 : i32
    %5 = arith.muli %arg1, %c128_i32 : i32
    %6 = tpu.assume_multiple %5, 128 : i32
    %c0_2 = arith.constant 0 : index
    %c0_3 = arith.constant 0 : index
    %7 = vector.load %arg8[%c0_2, %c0_3] : memref<128x128xf32, #tpu.memory_space<vmem>>, vector<128x128xf32>
    %8 = arith.index_cast %6 : i32 to index
    %c0_4 = arith.constant 0 : index
    %9 = vector.load %arg4[%8, %c0_4] : memref<128x128xbf16, #tpu.memory_space<vmem>>, vector<128x128xbf16>
    %cst = arith.constant dense<0.000000e+00> : vector<128x128xf32>
    %10 = tpu.matmul %4, %9, %cst {dimension_numbers = #tpu.dot_dimension_numbers<[1], [0], [0], [1], [0, 0, 1, 1], [], []>} : vector<128x128xbf16>, vector<128x128xbf16>, vector<128x128xf32> -> vector<128x128xf32>
    %11 = arith.addf %7, %10 : vector<128x128xf32>
    %c0_5 = arith.constant 0 : index
    %c0_6 = arith.constant 0 : index
    %12 = vector.load %arg8[%c0_5, %c0_6] : memref<128x128xf32, #tpu.memory_space<vmem>>, vector<128x128xf32>
    tpu.vector_store %arg8[%c0_5, %c0_6], %11 {strides = array<i32>} : memref<128x128xf32, #tpu.memory_space<vmem>>, vector<128x128xf32>,
    %c0_i32_7 = arith.constant 0 : i32
    %13 = arith.cmpi eq, %arg1, %c0_i32_7 : i32
    %14 = arith.extui %13 : i1 to i32
    %c0_i32_8 = arith.constant 0 : i32
    %15 = arith.cmpi ne, %14, %c0_i32_8 : i32
    scf.if %15 {
      %c128_i32_9 = arith.constant 128 : i32
      %16 = arith.muli %arg0, %c128_i32_9 : i32
      %17 = tpu.assume_multiple %16, 128 : i32
      %c0_10 = arith.constant 0 : index
      %c0_11 = arith.constant 0 : index
      %18 = vector.load %arg8[%c0_10, %c0_11] : memref<128x128xf32, #tpu.memory_space<vmem>>, vector<128x128xf32>
      %19 = arith.index_cast %17 : i32 to index
      %c0_12 = arith.constant 0 : index
      %20 = vector.load %arg3[%19, %c0_12] : memref<128x1xf32, #tpu.memory_space<vmem>>, vector<128x1xf32>
      %21 = vector.broadcast %20 : vector<128x1xf32> to vector<128x128xf32>
      %22 = arith.mulf %18, %21 : vector<128x128xf32>
      %23 = arith.index_cast %17 : i32 to index
      %c0_13 = arith.constant 0 : index
      %24 = vector.load %arg4[%23, %c0_13] : memref<128x128xbf16, #tpu.memory_space<vmem>>, vector<128x128xbf16>
      %25 = arith.truncf %22 : vector<128x128xf32> to vector<128x128xbf16>
      %c0_14 = arith.constant 0 : index
      %c0_15 = arith.constant 0 : index
      %26 = vector.load %arg5[%c0_14, %c0_15] : memref<256x128xbf16, #tpu.memory_space<vmem>>, vector<128x128xbf16>
      %cst_16 = arith.constant dense<0.000000e+00> : vector<128x128xf32>
      %27 = tpu.matmul %25, %26, %cst_16 {dimension_numbers = #tpu.dot_dimension_numbers<[1], [0], [0], [1], [0, 0, 1, 1], [], []>} : vector<128x128xbf16>, vector<128x128xbf16>, vector<128x128xf32> -> vector<128x128xf32>
      %c128 = arith.constant 128 : index
      %c0_17 = arith.constant 0 : index
      %28 = vector.load %arg5[%c128, %c0_17] : memref<256x128xbf16, #tpu.memory_space<vmem>>, vector<128x128xbf16>
      %cst_18 = arith.constant dense<0.000000e+00> : vector<128x128xf32>
      %29 = tpu.matmul %24, %28, %cst_18 {dimension_numbers = #tpu.dot_dimension_numbers<[1], [0], [0], [1], [0, 0, 1, 1], [], []>} : vector<128x128xbf16>, vector<128x128xbf16>, vector<128x128xf32> -> vector<128x128xf32>
      %30 = arith.addf %27, %29 : vector<128x128xf32>
      %c0_19 = arith.constant 0 : index
      %c0_20 = arith.constant 0 : index
      %31 = vector.load %arg6[%c0_19, %c0_20] : memref<1x128xf32, #tpu.memory_space<vmem>>, vector<1x128xf32>
      %32 = vector.broadcast %31 : vector<1x128xf32> to vector<128x128xf32>
      %33 = arith.addf %30, %32 : vector<128x128xf32>
      %34 = arith.mulf %33, %33 : vector<128x128xf32>
      %cst_21 = arith.constant dense<0.000000e+00> : vector<128xf32>
      %35 = vector.multi_reduction <add>, %34, %cst_21 [1] : vector<128x128xf32> to vector<128xf32>
      %36 = vector.shape_cast %35 : vector<128xf32> to vector<128x1xf32>
      %cst_22 = arith.constant 1.000000e-24 : f32
      %37 = vector.broadcast %cst_22 : f32 to vector<128x1xf32>
      %38 = arith.maximumf %36, %37 : vector<128x1xf32>
      %39 = math.rsqrt %38 : vector<128x1xf32>
      %40 = vector.broadcast %39 : vector<128x1xf32> to vector<128x128xf32>
      %41 = arith.mulf %33, %40 : vector<128x128xf32>
      %c0_23 = arith.constant 0 : index
      %c0_24 = arith.constant 0 : index
      %42 = vector.load %arg7[%c0_23, %c0_24] : memref<128x128xf32, #tpu.memory_space<vmem>>, vector<128x128xf32>
      tpu.vector_store %arg7[%c0_23, %c0_24], %41 {strides = array<i32>} : memref<128x128xf32, #tpu.memory_space<vmem>>, vector<128x128xf32>,
    } else {
    }
    return
  }
  func.func @transform_0(%arg0: i32, %arg1: i32) -> (i32, i32) {
    %c0_i32 = arith.constant 0 : i32
    return %arg0, %arg1 : i32, i32
  }
  func.func @transform_1(%arg0: i32, %arg1: i32) -> (i32, i32) {
    %c0_i32 = arith.constant 0 : i32
    %c0_i32_0 = arith.constant 0 : i32
    %c0_i32_1 = arith.constant 0 : i32
    return %c0_i32, %c0_i32_0 : i32, i32
  }
  func.func @transform_2(%arg0: i32, %arg1: i32) -> (i32, i32) {
    %c0_i32 = arith.constant 0 : i32
    %c0_i32_0 = arith.constant 0 : i32
    %c0_i32_1 = arith.constant 0 : i32
    return %c0_i32, %c0_i32_0 : i32, i32
  }
  func.func @transform_3(%arg0: i32, %arg1: i32) -> (i32, i32) {
    %c0_i32 = arith.constant 0 : i32
    %c0_i32_0 = arith.constant 0 : i32
    %c0_i32_1 = arith.constant 0 : i32
    return %c0_i32, %c0_i32_0 : i32, i32
  }
  func.func @transform_4(%arg0: i32, %arg1: i32) -> (i32, i32) {
    %c0_i32 = arith.constant 0 : i32
    %c0_i32_0 = arith.constant 0 : i32
    %c0_i32_1 = arith.constant 0 : i32
    return %c0_i32, %c0_i32_0 : i32, i32
  }
  func.func @transform_5(%arg0: i32, %arg1: i32) -> (i32, i32) {
    %c0_i32 = arith.constant 0 : i32
    %c0_i32_0 = arith.constant 0 : i32
    return %arg0, %c0_i32 : i32, i32
  }
}

</mosaic_0001>

<bundles_post_ra>
// kernel: forward.3
= control target key start
LH: loop header
LB: loop body
LE: loop exit
PB: predicated region body
PF: predicated region fallthrough
CT: control target
= control target key end

     0   :  { %v1217_v1 = vmov 0   ;;  %s1557_s2 = inlined_call_operand.vmem [shape: bf16[128,128], index: 2, kind: input, shape index: {}]   ;;  %s1558_s0 = inlined_call_operand.vmem [shape: s8[128,128], index: 0, kind: input, shape index: {}]   ;;  %s1559_s1 = inlined_call_operand.vmem [shape: f32[128,1], index: 1, kind: input, shape index: {}]   ;;  %s1560_s3 = inlined_call_operand.vmem [shape: bf16[256,128], index: 3, kind: input, shape index: {}]   ;;  %s1561_s4 = inlined_call_operand.vmem [shape: f32[1,128], index: 4, kind: input, shape index: {}]   ;;  %s1562_s5 = inlined_call_operand.vmem [shape: f32[128,128], index: 5, kind: output, shape index: {}]  }
   0x1   :  { %v1153_v0 = vld [vmem:[%s1557_s2] sm:$0xff]   ;;  %1152 = vset.pattern.permute.xlu1 %v1217_v1  ;;  %1151 = vset.pattern.permute.xlu0 %v1217_v1  ;;  %v1154_v2 = vld [vmem:[%s1557_s2 + $0x8] sm:$0xff]   ;;  %v1155_v3 = vld [vmem:[%s1557_s2 + $0x10] sm:$0xff]  }
   0x2   :  { %1022 = vmatprep.subr.bf16.mxu0 %v1153_v0  ;;  %v1156_v4 = vld [vmem:[%s1557_s2 + $0x18] sm:$0xff]   ;;  %v1263_v5 = vld [vmem:[%s1558_s0] sm:$0xff]  ;;  %v290_v7 = vld [vmem:[%s1559_s1 + $0x10] sm:$0xff] }
   0x3   :  { %1023 = vmatpush3.bf16.msra.mxu0 %v1153_v0  ;;  %v45_v6 = vunpack.c.l.s8.bf16 %v1263_v5  ;;  %v288_v8 = vld [vmem:[%s1559_s1] sm:$0xff]  ;;  %316 = vperm.xlu1 %1152, %v290_v7   ;;  %v291_v9 = vld [vmem:[%s1559_s1 + $0x18] sm:$0xff]  ;;  %v289_v10 = vld [vmem:[%s1559_s1 + $0x8] sm:$0xff]  ;;  %v46_v31 = vunpack.c.h.s8.bf16 %v1263_v5 }
   0x4   :  { %1024 = vmatprep.subr.bf16.mxu0 %v1154_v2  ;;  %306 = vperm.xlu0 %1151, %v288_v8   ;;  %v1157_v11 = vld [vmem:[%s1557_s2 + $0x20] sm:$0xff]   ;;  %v1158_v12 = vld [vmem:[%s1557_s2 + $0x28] sm:$0xff]   ;;  %v1159_v17 = vld [vmem:[%s1557_s2 + $0x30] sm:$0xff]  }
   0x5   :  { %1038 = vmatprep.mubr.bf16.mxu0 %v45_v6  ;;  %v297_v13 = vld [vmem:[%s1559_s1 + $0x48] sm:$0xff]  ;;  %v296_v14 = vld [vmem:[%s1559_s1 + $0x40] sm:$0xff]  ;;  %v299_v18 = vld [vmem:[%s1559_s1 + $0x58] sm:$0xff] }
   0x6   :  { %v1161_v15 = vld [vmem:[%s1560_s3 + $0x40] sm:$0xff]   ;;  %v1162_v16 = vld [vmem:[%s1560_s3 + $0x48] sm:$0xff]   ;;  %v298_v19 = vld [vmem:[%s1559_s1 + $0x50] sm:$0xff] }
   0x7   :  { %1025 = vmatpush3.bf16.msra.mxu0 %v1154_v2  ;;  %321 = vperm.xlu1 %1152, %v291_v9   ;;  %v1163_v20 = vld [vmem:[%s1560_s3 + $0x50] sm:$0xff]   ;;  %v293_v21 = vld [vmem:[%s1559_s1 + $0x28] sm:$0xff]  ;;  %v292_v22 = vld [vmem:[%s1559_s1 + $0x20] sm:$0xff] }
   0x8   :  { %1026 = vmatprep.subr.bf16.mxu0 %v1155_v3  ;;  %311 = vperm.xlu0 %1151, %v289_v10   ;;  %v1160_v23 = vld [vmem:[%s1557_s2 + $0x38] sm:$0xff]   ;;  %v294_v26 = vld [vmem:[%s1559_s1 + $0x30] sm:$0xff]  ;;  %v42_v27 = vld [vmem:[%s1558_s0 + $0x8] sm:$0xff] }
   0x9   :  { %1054 = vmatprep.subr.bf16.mxu1 %v1161_v15  ;;  %v1164_v24 = vld [vmem:[%s1560_s3 + $0x58] sm:$0xff]   ;;  %v1165_v28 = vld [vmem:[%s1560_s3] sm:$0xff]   ;;  %v301_v30 = vld [vmem:[%s1559_s1 + $0x68] sm:$0xff]  ;;  %v47_v33 = vunpack.c.l.s8.bf16 %v42_v27  ;;  %v48_v42 = vunpack.c.h.s8.bf16 %v42_v27 }
   0xa   :  { %1055 = vmatpush3.bf16.msra.mxu1 %v1161_v15  ;;  %v295_v25 = vld [vmem:[%s1559_s1 + $0x38] sm:$0xff]  ;;  %v1166_v29 = vld [vmem:[%s1560_s3 + $0x60] sm:$0xff]   ;;  %v1167_v34 = vld [vmem:[%s1560_s3 + $0x8] sm:$0xff]  }
   0xb   :  { %1027 = vmatpush3.bf16.msra.mxu0 %v1155_v3  ;;  %351 = vperm.xlu1 %1152, %v297_v13   ;;  %v300_v32 = vld [vmem:[%s1559_s1 + $0x60] sm:$0xff]  ;;  %v1168_v35 = vld [vmem:[%s1560_s3 + $0x68] sm:$0xff]   ;;  %v303_v37 = vld [vmem:[%s1559_s1 + $0x78] sm:$0xff] }
   0xc   :  { %1028 = vmatprep.subr.bf16.mxu0 %v1156_v4  ;;  %346 = vperm.xlu0 %1151, %v296_v14   ;;  %v1173_v36 = vld [vmem:[%s1557_s2] sm:$0xff]   ;;  %v43_v38 = vld [vmem:[%s1558_s0 + $0x10] sm:$0xff]  ;;  %v1171_v44 = vld [vmem:[%s1560_s3 + $0x18] sm:$0xff]  }
   0xd   :  { %1056 = vmatprep.subr.bf16.mxu1 %v1162_v16  ;;  %v302_v39 = vld [vmem:[%s1559_s1 + $0x70] sm:$0xff]  ;;  %1070 = vmatprep.mubr.bf16.mxu1 %v1173_v36  ;;  %v49_v43 = vunpack.c.l.s8.bf16 %v43_v38  ;;  %v1172_v45 = vld [vmem:[%s1560_s3 + $0x78] sm:$0xff]   ;;  %v1174_v47 = vld [vmem:[%s1560_s3 + $0x20] sm:$0xff]   ;;  %v50_v48 = vunpack.c.h.s8.bf16 %v43_v38 }
   0xe   :  { %1057 = vmatpush3.bf16.msra.mxu1 %v1162_v16  ;;  %v1169_v40 = vld [vmem:[%s1560_s3 + $0x10] sm:$0xff]   ;;  %v44_v46 = vld [vmem:[%s1558_s0 + $0x18] sm:$0xff]  ;;  %v1175_v50 = vld [vmem:[%s1557_s2 + $0x8] sm:$0xff]  }
   0xf   :  { %1029 = vmatpush3.bf16.msra.mxu0 %v1156_v4  ;;  %361 = vperm.xlu1 %1152, %v299_v18   ;;  %v1170_v41 = vld [vmem:[%s1560_s3 + $0x70] sm:$0xff]   ;;  %v51_v49 = vunpack.c.l.s8.bf16 %v44_v46  ;;  %v1176_v51 = vld [vmem:[%s1560_s3 + $0x28] sm:$0xff]   ;;  %v52_v52 = vunpack.c.h.s8.bf16 %v44_v46  ;;  %v1179_v55 = vld [vmem:[%s1557_s2 + $0x18] sm:$0xff]  }
  0x10   :  { %1030 = vmatprep.subr.bf16.mxu0 %v1157_v11  ;;  %356 = vperm.xlu0 %1151, %v298_v19   ;;  %v1177_v53 = vld [vmem:[%s1557_s2 + $0x10] sm:$0xff]   ;;  %v1180_v56 = vld [vmem:[%s1560_s3 + $0x38] sm:$0xff]   ;;  %v1181_v57 = vld [vmem:[%s1557_s2 + $0x20] sm:$0xff]  }
  0x11   :  { %1058 = vmatprep.subr.bf16.mxu1 %v1163_v20  ;;  %v1178_v54 = vld [vmem:[%s1560_s3 + $0x30] sm:$0xff]   ;;  %v1182_v58 = vld [vmem:[%s1557_s2 + $0x28] sm:$0xff]   ;;  %v1184_v60 = vld [vmem:[%s1557_s2 + $0x38] sm:$0xff]  }
  0x12   :  { %1059 = vmatpush3.bf16.msra.mxu1 %v1163_v20  ;;  %v1183_v59 = vld [vmem:[%s1557_s2 + $0x30] sm:$0xff]  }
  0x13   :  { %1031 = vmatpush3.bf16.msra.mxu0 %v1157_v11  ;;  %331 = vperm.xlu1 %1152, %v293_v21  }
  0x14   :  { %1032 = vmatprep.subr.bf16.mxu0 %v1158_v12  ;;  %326 = vperm.xlu0 %1151, %v292_v22  }
  0x15   :  { %1060 = vmatprep.subr.bf16.mxu1 %v1164_v24 }
  0x16   :  { %1061 = vmatpush3.bf16.msra.mxu1 %v1164_v24 }
  0x17   :  { %1033 = vmatpush3.bf16.msra.mxu0 %v1158_v12  ;;  %341 = vperm.xlu1 %1152, %v295_v25  }
  0x18   :  { %1034 = vmatprep.subr.bf16.mxu0 %v1159_v17  ;;  %336 = vperm.xlu0 %1151, %v294_v26  }
  0x19   :  { %1062 = vmatprep.subr.bf16.mxu1 %v1166_v29 }
  0x1a   :  { %1063 = vmatpush3.bf16.msra.mxu1 %v1166_v29 }
  0x1b   :  { %1035 = vmatpush3.bf16.msra.mxu0 %v1159_v17  ;;  %371 = vperm.xlu1 %1152, %v301_v30  }
  0x1c   :  { %1036 = vmatprep.subr.bf16.mxu0 %v1160_v23  ;;  %366 = vperm.xlu0 %1151, %v300_v32  }
  0x1d   :  { %1064 = vmatprep.subr.bf16.mxu1 %v1168_v35 }
  0x1e   :  { %1065 = vmatpush3.bf16.msra.mxu1 %v1168_v35 }
  0x1f   :  { %1037 = vmatpush3.bf16.msra.mxu0 %v1160_v23  ;;  %381 = vperm.xlu1 %1152, %v303_v37  }
  0x20   :  { %1086 = vmatprep.subr.bf16.mxu0 %v1165_v28  ;;  %376 = vperm.xlu0 %1151, %v302_v39  }
  0x21   :  { %1066 = vmatprep.subr.bf16.mxu1 %v1170_v41 }
  0x22   :  { %1039 = vmatmul.mubr.bf16.vlgmr.msra.gmra.mrb[0].mxu0 %v46_v31  ;;  %1067 = vmatpush3.bf16.msra.mxu1 %v1170_v41 }
  0x23   :  { %1042 = vmatprep.mubr.bf16.mxu0 %v47_v33  ;;  %1087 = vmatpush3.bf16.msra.mxu0 %v1165_v28 }
  0x24   :  { %1088 = vmatprep.subr.bf16.mxu0 %v1167_v34  ;;  %1068 = vmatprep.subr.bf16.mxu1 %v1172_v45 }
  0x26   :  { %1069 = vmatpush3.bf16.msra.mxu1 %v1172_v45 }
  0x27   :  { %1089 = vmatpush3.bf16.msra.mxu0 %v1167_v34  ;;  %1118 = vmatprep.subr.bf16.mxu1 %v1165_v28 }
  0x28   :  { %1090 = vmatprep.subr.bf16.mxu0 %v1169_v40 }
  0x29   :  { %1071 = vmatmul.mubr.bf16.vlgmr.msra.gmra.mrb[0].mxu1 %v1175_v50 }
  0x2a   :  { %1043 = vmatmul.mubr.bf16.gmra.mrb[4].mxu0 %v48_v42  ;;  %1126 = vmatpush3.bf16.msra.mxu1 %v1165_v28 }
  0x2b   :  { %1046 = vmatprep.mubr.bf16.mxu0 %v49_v43  ;;  %1091 = vmatpush3.bf16.msra.mxu0 %v1169_v40 }
  0x2c   :  { %1092 = vmatprep.subr.bf16.mxu0 %v1171_v44  ;;  %1119 = vmatprep.subr.bf16.mxu1 %v1167_v34 }
  0x2d   :  { %1074 = vmatprep.mubr.bf16.mxu1 %v1177_v53 }
  0x2e   :  { %1127 = vmatpush3.bf16.msra.mxu1 %v1167_v34 }
  0x2f   :  { %1093 = vmatpush3.bf16.msra.mxu0 %v1171_v44  ;;  %1120 = vmatprep.subr.bf16.mxu1 %v1169_v40 }
  0x30   :  { %1094 = vmatprep.subr.bf16.mxu0 %v1174_v47 }
  0x31   :  { %1075 = vmatmul.mubr.bf16.gmra.mrb[4].mxu1 %v1179_v55 }
  0x32   :  { %1047 = vmatmul.mubr.bf16.gmra.mrb[8].mxu0 %v50_v48  ;;  %1128 = vmatpush3.bf16.msra.mxu1 %v1169_v40 }
  0x33   :  { %1050 = vmatprep.mubr.bf16.mxu0 %v51_v49  ;;  %1095 = vmatpush3.bf16.msra.mxu0 %v1174_v47 }
  0x34   :  { %1096 = vmatprep.subr.bf16.mxu0 %v1176_v51  ;;  %1121 = vmatprep.subr.bf16.mxu1 %v1171_v44 }
  0x35   :  { %1078 = vmatprep.mubr.bf16.mxu1 %v1181_v57 }
  0x36   :  { %1129 = vmatpush3.bf16.msra.mxu1 %v1171_v44 }
  0x37   :  { %1097 = vmatpush3.bf16.msra.mxu0 %v1176_v51  ;;  %1122 = vmatprep.subr.bf16.mxu1 %v1174_v47 }
  0x38   :  { %1098 = vmatprep.subr.bf16.mxu0 %v1178_v54 }
  0x39   :  { %1079 = vmatmul.mubr.bf16.gmra.mrb[8].mxu1 %v1182_v58 }
  0x3a   :  { %1051 = vmatmul.mubr.bf16.gmra.mrb[12].mxu0 %v52_v52  ;;  %1130 = vmatpush3.bf16.msra.mxu1 %v1174_v47 }
  0x3b   :  { %1123 = vmatprep.subr.bf16.mxu1 %v1176_v51  ;;  %1099 = vmatpush3.bf16.msra.mxu0 %v1178_v54 }
  0x3c   :  { %1100 = vmatprep.subr.bf16.mxu0 %v1180_v56  ;;  %1082 = vmatprep.mubr.bf16.mxu1 %v1183_v59 }
  0x3e   :  { %1131 = vmatpush3.bf16.msra.mxu1 %v1176_v51 }
  0x3f   :  { %1124 = vmatprep.subr.bf16.mxu1 %v1178_v54  ;;  %1101 = vmatpush3.bf16.msra.mxu0 %v1180_v56 }
  0x41   :  { %1083 = vmatmul.mubr.bf16.gmra.mrb[12].mxu1 %v1184_v60 }
  0x42   :  { %1132 = vmatpush3.bf16.msra.mxu1 %v1178_v54 }
  0x43   :  { %1125 = vmatprep.subr.bf16.mxu1 %v1180_v56 }
  0x46   :  { %1133 = vmatpush3.bf16.msra.mxu1 %v1180_v56 }
  0x82   :  { %v317_v61 = vpop.permute.xlu1 %316 }
  0x83   :  { %v307_v62 = vpop.permute.xlu0 %306 }
  0x86   :  { %v322_v63 = vpop.permute.xlu1 %321 }
  0x87   :  { %v312_v0 = vpop.permute.xlu0 %311 }
  0x8a   :  { %v352_v1 = vpop.permute.xlu1 %351 }
  0x8b   :  { %v347_v2 = vpop.permute.xlu0 %346 }
  0x8e   :  { %v362_v3 = vpop.permute.xlu1 %361 }
  0x8f   :  { %v357_v4 = vpop.permute.xlu0 %356 }
  0x92   :  { %v332_v8 = vpop.permute.xlu1 %331 }
  0x93   :  { %v327_v12 = vpop.permute.xlu0 %326 }
  0x96   :  { %v342_v18 = vpop.permute.xlu1 %341 }
  0x97   :  { %v337_v20 = vpop.permute.xlu0 %336 }
  0x9a   :  { %v372_v29 = vpop.permute.xlu1 %371 }
  0x9b   :  { %v367_v39 = vpop.permute.xlu0 %366 }
  0x9e   :  { %v382_v46 = vpop.permute.xlu1 %381 }
  0x9f   :  { %v377_v48 = vpop.permute.xlu0 %376 }
  0xf5   :  { %v1040_v5 = vpop.f32.mrb[0].mxu0 }
  0xf6   :  { %v172_v6 = vpop.f32.mrb[1].mxu0  ;;  %v386_v9 = vmul.f32 %v1040_v5, %v317_v61 }
  0xf7   :  { %v1041_v7 = vpop.f32.mrb[2].mxu0  ;;  %v384_v13 = vmul.f32 %v307_v62, %v172_v6  ;;  %v1411_v62 = vld [vmem:[%s1561_s4] ss:$0 sm:$0xff] }
  0xf8   :  { %v387_v10 = vmul.f32 %v1041_v7, %v322_v63  ;;  %v175_v11 = vpop.f32.mrb[3].mxu0 }
  0xf9   :  { %v385_v14 = vmul.f32 %v312_v0, %v175_v11 }
  0xfa   :  { %v421_v15 = vpack.c.bf16 %v387_v10, %v386_v9 }
  0xfb   :  { %v420_v16 = vpack.c.bf16 %v385_v14, %v384_v13 }
  0xfc   :  { %v1072_v32 = vpop.f32.mrb[0].mxu1 }
  0xfd   :  { %v1044_v17 = vpop.f32.mrb[4].mxu0  ;;  %1102 = vmatprep.mubr.bf16.mxu0 %v420_v16  ;;  %v590_v34 = vpop.f32.mrb[1].mxu1 }
  0xfe   :  { %v188_v19 = vpop.f32.mrb[5].mxu0  ;;  %1103 = vmatmul.mubr.bf16.vlgmr.msra.gmra.mrb[16].mxu0 %v421_v15  ;;  %v390_v22 = vmul.f32 %v1044_v17, %v337_v20  ;;  %v1073_v38 = vpop.f32.mrb[2].mxu1 }
  0xff   :  { %v1045_v21 = vpop.f32.mrb[6].mxu0  ;;  %v388_v25 = vmul.f32 %v327_v12, %v188_v19  ;;  %v593_v42 = vpop.f32.mrb[3].mxu1 }
 0x100   :  { %v391_v23 = vmul.f32 %v1045_v21, %v342_v18  ;;  %v191_v24 = vpop.f32.mrb[7].mxu0 }
 0x101   :  { %v389_v26 = vmul.f32 %v332_v8, %v191_v24 }
 0x102   :  { %v423_v27 = vpack.c.bf16 %v391_v23, %v390_v22 }
 0x103   :  { %v422_v28 = vpack.c.bf16 %v389_v26, %v388_v25 }
 0x104   :  { %v1076_v57 = vpop.f32.mrb[4].mxu1 }
 0x105   :  { %v1048_v30 = vpop.f32.mrb[8].mxu0  ;;  %1106 = vmatprep.mubr.bf16.mxu0 %v422_v28  ;;  %v606_v58 = vpop.f32.mrb[5].mxu1 }
 0x106   :  { %v204_v31 = vpop.f32.mrb[9].mxu0  ;;  %1107 = vmatmul.mubr.bf16.gmra.mrb[20].mxu0 %v423_v27  ;;  %v394_v35 = vmul.f32 %v1048_v30, %v357_v4  ;;  %v1077_v59 = vpop.f32.mrb[6].mxu1 }
 0x107   :  { %v1049_v33 = vpop.f32.mrb[10].mxu0  ;;  %v392_v40 = vmul.f32 %v347_v2, %v204_v31  ;;  %v609_v60 = vpop.f32.mrb[7].mxu1 }
 0x108   :  { %v395_v36 = vmul.f32 %v1049_v33, %v362_v3  ;;  %v207_v37 = vpop.f32.mrb[11].mxu0 }
 0x109   :  { %v393_v41 = vmul.f32 %v352_v1, %v207_v37 }
 0x10a   :  { %v425_v43 = vpack.c.bf16 %v395_v36, %v394_v35 }
 0x10b   :  { %v424_v44 = vpack.c.bf16 %v393_v41, %v392_v40 }
 0x10d   :  { %v1052_v45 = vpop.f32.mrb[12].mxu0  ;;  %1110 = vmatprep.mubr.bf16.mxu1 %v424_v44 }
 0x10e   :  { %v220_v47 = vpop.f32.mrb[13].mxu0  ;;  %1111 = vmatmul.mubr.bf16.vlgmr.msra.gmra.mrb[8].mxu1 %v425_v43  ;;  %v398_v50 = vmul.f32 %v1052_v45, %v377_v48 }
 0x10f   :  { %v1053_v49 = vpop.f32.mrb[14].mxu0  ;;  %v396_v53 = vmul.f32 %v367_v39, %v220_v47 }
 0x110   :  { %v399_v51 = vmul.f32 %v1053_v49, %v382_v46  ;;  %v223_v52 = vpop.f32.mrb[15].mxu0 }
 0x111   :  { %v397_v54 = vmul.f32 %v372_v29, %v223_v52 }
 0x112   :  { %v427_v55 = vpack.c.bf16 %v399_v51, %v398_v50 }
 0x113   :  { %v426_v56 = vpack.c.bf16 %v397_v54, %v396_v53 }
 0x115   :  { %1114 = vmatprep.mubr.bf16.mxu1 %v426_v56 }
 0x116   :  { %1115 = vmatmul.mubr.bf16.gmra.mrb[12].mxu1 %v427_v55 }
 0x1d1   :  { %v1104_v61 = vpop.f32.mrb[16].mxu0 }
 0x1d2   :  { %v744_v63 = vadd.f32 %v1104_v61, %v1072_v32  ;;  %v735_v0 = vpop.f32.mrb[17].mxu0 }
 0x1d3   :  { %v736_v1 = vadd.f32 %v735_v0, %v590_v34  ;;  %v1105_v2 = vpop.f32.mrb[18].mxu0 }
 0x1d4   :  { %v1414_v3 = vadd.f32 %v1411_v62, %v744_v63  ;;  %v747_v4 = vadd.f32 %v1105_v2, %v1073_v38  ;;  %v738_v5 = vpop.f32.mrb[19].mxu0 }
 0x1d5   :  { %v739_v6 = vadd.f32 %v738_v5, %v593_v42  ;;  %v1417_v7 = vadd.f32 %v1411_v62, %v736_v1 }
 0x1d6   :  { %v823_v8 = vmul.f32 %v1414_v3, %v1414_v3  ;;  %v1427_v12 = vadd.f32 %v1411_v62, %v747_v4 }
 0x1d7   :  { %v1422_v9 = vadd.f32 %v1411_v62, %v739_v6  ;;  %v821_v15 = vmul.f32 %v1417_v7, %v1417_v7 }
 0x1d8   :  { %841 = vadd.xlane.f32.xlu0 %v823_v8  ;;  %v824_v25 = vmul.f32 %v1427_v12, %v1427_v12 }
 0x1d9   :  { %v1108_v10 = vpop.f32.mrb[20].mxu0  ;;  %v822_v11 = vmul.f32 %v1422_v9, %v1422_v9 }
 0x1da   :  { %v760_v13 = vadd.f32 %v1108_v10, %v1076_v57  ;;  %v751_v14 = vpop.f32.mrb[21].mxu0 }
 0x1db   :  { %v752_v16 = vadd.f32 %v751_v14, %v606_v58  ;;  %v1109_v17 = vpop.f32.mrb[22].mxu0  ;;  %839 = vadd.xlane.f32.xlu1 %v822_v11 }
 0x1dc   :  { %v1432_v18 = vadd.f32 %v1411_v62, %v760_v13  ;;  %v763_v19 = vadd.f32 %v1109_v17, %v1077_v59  ;;  %v754_v20 = vpop.f32.mrb[23].mxu0  ;;  %837 = vadd.xlane.f32.xlu0 %v821_v15 }
 0x1dd   :  { %v755_v21 = vadd.f32 %v754_v20, %v609_v60  ;;  %v1435_v22 = vadd.f32 %v1411_v62, %v752_v16 }
 0x1de   :  { %v1438_v23 = vadd.f32 %v1411_v62, %v763_v19  ;;  %v827_v24 = vmul.f32 %v1432_v18, %v1432_v18 }
 0x1df   :  { %v1445_v27 = vadd.f32 %v1411_v62, %v755_v21  ;;  %v825_v30 = vmul.f32 %v1435_v22, %v1435_v22 }
 0x1e0   :  { %849 = vadd.xlane.f32.xlu1 %v827_v24  ;;  %843 = vadd.xlane.f32.xlu0 %v824_v25  ;;  %v828_v31 = vmul.f32 %v1438_v23, %v1438_v23 }
 0x1e1   :  { %v1112_v26 = vpop.f32.mrb[8].mxu1  ;;  %v826_v37 = vmul.f32 %v1445_v27, %v1445_v27 }
 0x1e2   :  { %v1448_v28 = vadd.f32 %v1112_v26, %v1411_v62  ;;  %v767_v29 = vpop.f32.mrb[9].mxu1 }
 0x1e3   :  { %v1113_v32 = vpop.f32.mrb[10].mxu1  ;;  %v1455_v34 = vadd.f32 %v1411_v62, %v767_v29 }
 0x1e4   :  { %v770_v33 = vpop.f32.mrb[11].mxu1  ;;  %845 = vadd.xlane.f32.xlu1 %v825_v30  ;;  %851 = vadd.xlane.f32.xlu0 %v828_v31  ;;  %v1458_v35 = vadd.f32 %v1113_v32, %v1411_v62  ;;  %v831_v36 = vmul.f32 %v1448_v28, %v1448_v28 }
 0x1e5   :  { %v1465_v39 = vadd.f32 %v1411_v62, %v770_v33  ;;  %v829_v41 = vmul.f32 %v1455_v34, %v1455_v34 }
 0x1e6   :  { %v832_v42 = vmul.f32 %v1458_v35, %v1458_v35 }
 0x1e7   :  { %v830_v49 = vmul.f32 %v1465_v39, %v1465_v39 }
 0x1e8   :  { %857 = vadd.xlane.f32.xlu1 %v831_v36  ;;  %847 = vadd.xlane.f32.xlu0 %v826_v37 }
 0x1e9   :  { %v1116_v38 = vpop.f32.mrb[12].mxu1 }
 0x1ea   :  { %v783_v40 = vpop.f32.mrb[13].mxu1  ;;  %v1477_v47 = vadd.f32 %v1116_v38, %v1411_v62 }
 0x1eb   :  { %v1472_v43 = vadd.f32 %v1411_v62, %v783_v40  ;;  %v1117_v44 = vpop.f32.mrb[14].mxu1 }
 0x1ec   :  { %853 = vadd.xlane.f32.xlu1 %v829_v41  ;;  %859 = vadd.xlane.f32.xlu0 %v832_v42  ;;  %v786_v45 = vpop.f32.mrb[15].mxu1  ;;  %v1485_v50 = vadd.f32 %v1117_v44, %v1411_v62  ;;  %v835_v51 = vmul.f32 %v1477_v47, %v1477_v47 }
 0x1ed   :  { %v833_v46 = vmul.f32 %v1472_v43, %v1472_v43  ;;  %v1480_v48 = vadd.f32 %v1411_v62, %v786_v45 }
 0x1ee   :  { %v836_v53 = vmul.f32 %v1485_v50, %v1485_v50 }
 0x1ef   :  { %v834_v52 = vmul.f32 %v1480_v48, %v1480_v48 }
 0x1f0   :  { %855 = vadd.xlane.f32.xlu0 %v830_v49  ;;  %861 = vadd.xlane.f32.xlu1 %v833_v46 }
 0x1f4   :  { %865 = vadd.xlane.f32.xlu1 %v835_v51  ;;  %863 = vadd.xlane.f32.xlu0 %v834_v52 }
 0x1f8   :  { %867 = vadd.xlane.f32.xlu0 %v836_v53 }
 0x265   :  { %v842_v54 = vpop.xlane.xlu0 %841 }
 0x266   :  { %v871_v55 = vmax.f32 %v842_v54, 1e-24 }
 0x268   :  { %1185 = vrsqrt.f32 %v871_v55  ;;  %v840_v56 = vpop.xlane.xlu1 %839 }
 0x269   :  { %v870_v57 = vmax.f32 %v840_v56, 1e-24  ;;  %v838_v58 = vpop.xlane.xlu0 %837 }
 0x26a   :  { %v869_v59 = vmax.f32 %v838_v58, 1e-24 }
 0x26b   :  { %1187 = vrsqrt.f32 %v870_v57 }
 0x26c   :  { %1189 = vrsqrt.f32 %v869_v59 }
 0x26d   :  { %v850_v60 = vpop.xlane.xlu1 %849  ;;  %v844_v61 = vpop.xlane.xlu0 %843 }
 0x26e   :  { %v875_v62 = vmax.f32 %v850_v60, 1e-24  ;;  %v872_v63 = vmax.f32 %v844_v61, 1e-24 }
 0x270   :  { %1191 = vrsqrt.f32 %v875_v62 }
 0x271   :  { %1193 = vrsqrt.f32 %v872_v63  ;;  %v846_v0 = vpop.xlane.xlu1 %845  ;;  %v852_v1 = vpop.xlane.xlu0 %851 }
 0x272   :  { %v1186_v2 = vpop.eup %1185  ;;  %v873_v4 = vmax.f32 %v846_v0, 1e-24  ;;  %v876_v5 = vmax.f32 %v852_v1, 1e-24 }
 0x273   :  { %v903_v6 = vmul.f32 %v1186_v2, %v1414_v3 }
 0x274   :  { %1195 = vrsqrt.f32 %v873_v4 }
 0x275   :  { %v1188_v8 = vpop.eup %1187  ;;  %919 = vst [vmem:[%s1562_s5 + $0x10] sm:$0xff] %v903_v6  ;;  %1197 = vrsqrt.f32 %v876_v5  ;;  %v858_v10 = vpop.xlane.xlu1 %857 }
 0x276   :  { %v848_v11 = vpop.xlane.xlu0 %847  ;;  %v1190_v13 = vpop.eup %1189  ;;  %v902_v14 = vmul.f32 %v1188_v8, %v1422_v9  ;;  %v879_v15 = vmax.f32 %v858_v10, 1e-24 }
 0x277   :  { %v874_v16 = vmax.f32 %v848_v11, 1e-24  ;;  %v901_v17 = vmul.f32 %v1190_v13, %v1417_v7 }
 0x278   :  { %918 = vst [vmem:[%s1562_s5 + $0x8] sm:$0xff] %v902_v14  ;;  %1199 = vrsqrt.f32 %v879_v15 }
 0x279   :  { %917 = vst [vmem:[%s1562_s5] sm:$0xff] %v901_v17  ;;  %1201 = vrsqrt.f32 %v874_v16  ;;  %v854_v3 = vpop.xlane.xlu1 %853 }
 0x27a   :  { %v860_v19 = vpop.xlane.xlu0 %859  ;;  %v1192_v20 = vpop.eup %1191  ;;  %v877_v21 = vmax.f32 %v854_v3, 1e-24 }
 0x27b   :  { %v880_v24 = vmax.f32 %v860_v19, 1e-24  ;;  %v1194_v9 = vpop.eup %1193  ;;  %v907_v25 = vmul.f32 %v1192_v20, %v1432_v18 }
 0x27c   :  { %v904_v7 = vmul.f32 %v1194_v9, %v1427_v12  ;;  %1203 = vrsqrt.f32 %v877_v21 }
 0x27d   :  { %923 = vst [vmem:[%s1562_s5 + $0x30] sm:$0xff] %v907_v25  ;;  %1205 = vrsqrt.f32 %v880_v24  ;;  %v862_v29 = vpop.xlane.xlu1 %861 }
 0x27e   :  { %v856_v26 = vpop.xlane.xlu0 %855  ;;  %v1196_v30 = vpop.eup %1195  ;;  %920 = vst [vmem:[%s1562_s5 + $0x18] sm:$0xff] %v904_v7  ;;  %v881_v32 = vmax.f32 %v862_v29, 1e-24 }
 0x27f   :  { %v878_v31 = vmax.f32 %v856_v26, 1e-24  ;;  %v1198_v33 = vpop.eup %1197  ;;  %v905_v18 = vmul.f32 %v1196_v30, %v1435_v22 }
 0x280   :  { %v908_v12 = vmul.f32 %v1198_v33, %v1438_v23 }
 0x281   :  { %1207 = vrsqrt.f32 %v878_v31  ;;  %921 = vst [vmem:[%s1562_s5 + $0x20] sm:$0xff] %v905_v18  ;;  %v866_v36 = vpop.xlane.xlu1 %865 }
 0x282   :  { %1209 = vrsqrt.f32 %v881_v32  ;;  %v864_v37 = vpop.xlane.xlu0 %863  ;;  %v1200_v38 = vpop.eup %1199  ;;  %924 = vst [vmem:[%s1562_s5 + $0x38] sm:$0xff] %v908_v12  ;;  %v883_v40 = vmax.f32 %v866_v36, 1e-24 }
 0x283   :  { %v882_v41 = vmax.f32 %v864_v37, 1e-24  ;;  %v1202_v42 = vpop.eup %1201  ;;  %v911_v22 = vmul.f32 %v1200_v38, %v1448_v28 }
 0x284   :  { %v906_v23 = vmul.f32 %v1202_v42, %v1445_v27  ;;  %1211 = vrsqrt.f32 %v883_v40 }
 0x285   :  { %927 = vst [vmem:[%s1562_s5 + $0x50] sm:$0xff] %v911_v22  ;;  %1213 = vrsqrt.f32 %v882_v41 }
 0x286   :  { %v868_v44 = vpop.xlane.xlu0 %867  ;;  %v1204_v45 = vpop.eup %1203  ;;  %922 = vst [vmem:[%s1562_s5 + $0x28] sm:$0xff] %v906_v23 }
 0x287   :  { %v884_v46 = vmax.f32 %v868_v44, 1e-24  ;;  %v1206_v49 = vpop.eup %1205  ;;  %v909_v51 = vmul.f32 %v1204_v45, %v1455_v34 }
 0x288   :  { %v912_v28 = vmul.f32 %v1206_v49, %v1458_v35 }
 0x289   :  { %1215 = vrsqrt.f32 %v884_v46  ;;  %925 = vst [vmem:[%s1562_s5 + $0x40] sm:$0xff] %v909_v51 }
 0x28a   :  { %928 = vst [vmem:[%s1562_s5 + $0x58] sm:$0xff] %v912_v28 }
 0x28b   :  { %v1208_v27 = vpop.eup %1207 }
 0x28c   :  { %v1210_v52 = vpop.eup %1209  ;;  %v910_v53 = vmul.f32 %v1208_v27, %v1465_v39 }
 0x28d   :  { %v913_v54 = vmul.f32 %v1210_v52, %v1472_v43 }
 0x28e   :  { %926 = vst [vmem:[%s1562_s5 + $0x48] sm:$0xff] %v910_v53  ;;  %v1212_v34 = vpop.eup %1211 }
 0x28f   :  { %929 = vst [vmem:[%s1562_s5 + $0x60] sm:$0xff] %v913_v54  ;;  %v1214_v35 = vpop.eup %1213  ;;  %v915_v55 = vmul.f32 %v1212_v34, %v1477_v47 }
 0x290   :  { %v914_v56 = vmul.f32 %v1214_v35, %v1480_v48 }
 0x291   :  { %931 = vst [vmem:[%s1562_s5 + $0x70] sm:$0xff] %v915_v55 }
 0x292   :  { %930 = vst [vmem:[%s1562_s5 + $0x68] sm:$0xff] %v914_v56 }
 0x293   :  { %v1216_v39 = vpop.eup %1215 }
 0x294   :  { %v916_v43 = vmul.f32 %v1216_v39, %v1485_v50 }
 0x296   :  { %932 = vst [vmem:[%s1562_s5 + $0x78] sm:$0xff] %v916_v43 }

// kernel: forward.2
= control target key start
LH: loop header
LB: loop body
LE: loop exit
PB: predicated region body
PF: predicated region fallthrough
CT: control target
= control target key end

     0   :  { %v1376_v1 = vmov 0   ;;  %s1692_s2 = inlined_call_operand.vmem [shape: bf16[128,128], index: 2, kind: input, shape index: {}]   ;;  %s1693_s0 = inlined_call_operand.vmem [shape: s8[128,128], index: 0, kind: input, shape index: {}]   ;;  %s1694_s1 = inlined_call_operand.vmem [shape: f32[128,1], index: 1, kind: input, shape index: {}]   ;;  %s1695_s3 = inlined_call_operand.vmem [shape: bf16[256,128], index: 3, kind: input, shape index: {}]   ;;  %s1696_s4 = inlined_call_operand.vmem [shape: f32[1,128], index: 4, kind: input, shape index: {}]   ;;  %s1697_s5 = inlined_call_operand.vmem [shape: bf16[128,128], index: 5, kind: output, shape index: {}]  }
   0x1   :  { %v1312_v0 = vld [vmem:[%s1692_s2] sm:$0xff]   ;;  %1311 = vset.pattern.permute.xlu1 %v1376_v1  ;;  %1310 = vset.pattern.permute.xlu0 %v1376_v1  ;;  %v1313_v2 = vld [vmem:[%s1692_s2 + $0x8] sm:$0xff]   ;;  %v1314_v3 = vld [vmem:[%s1692_s2 + $0x10] sm:$0xff]  }
   0x2   :  { %1181 = vmatprep.subr.bf16.mxu0 %v1312_v0  ;;  %v1315_v4 = vld [vmem:[%s1692_s2 + $0x18] sm:$0xff]   ;;  %v1422_v5 = vld [vmem:[%s1693_s0] sm:$0xff]  ;;  %v290_v7 = vld [vmem:[%s1694_s1 + $0x10] sm:$0xff] }
   0x3   :  { %1182 = vmatpush3.bf16.msra.mxu0 %v1312_v0  ;;  %v45_v6 = vunpack.c.l.s8.bf16 %v1422_v5  ;;  %v288_v8 = vld [vmem:[%s1694_s1] sm:$0xff]  ;;  %316 = vperm.xlu1 %1311, %v290_v7   ;;  %v291_v9 = vld [vmem:[%s1694_s1 + $0x18] sm:$0xff]  ;;  %v289_v10 = vld [vmem:[%s1694_s1 + $0x8] sm:$0xff]  ;;  %v46_v31 = vunpack.c.h.s8.bf16 %v1422_v5 }
   0x4   :  { %1183 = vmatprep.subr.bf16.mxu0 %v1313_v2  ;;  %306 = vperm.xlu0 %1310, %v288_v8   ;;  %v1316_v11 = vld [vmem:[%s1692_s2 + $0x20] sm:$0xff]   ;;  %v1317_v12 = vld [vmem:[%s1692_s2 + $0x28] sm:$0xff]   ;;  %v1318_v17 = vld [vmem:[%s1692_s2 + $0x30] sm:$0xff]  }
   0x5   :  { %1197 = vmatprep.mubr.bf16.mxu0 %v45_v6  ;;  %v297_v13 = vld [vmem:[%s1694_s1 + $0x48] sm:$0xff]  ;;  %v296_v14 = vld [vmem:[%s1694_s1 + $0x40] sm:$0xff]  ;;  %v299_v18 = vld [vmem:[%s1694_s1 + $0x58] sm:$0xff] }
   0x6   :  { %v1320_v15 = vld [vmem:[%s1695_s3 + $0x40] sm:$0xff]   ;;  %v1321_v16 = vld [vmem:[%s1695_s3 + $0x48] sm:$0xff]   ;;  %v298_v19 = vld [vmem:[%s1694_s1 + $0x50] sm:$0xff] }
   0x7   :  { %1184 = vmatpush3.bf16.msra.mxu0 %v1313_v2  ;;  %321 = vperm.xlu1 %1311, %v291_v9   ;;  %v1322_v20 = vld [vmem:[%s1695_s3 + $0x50] sm:$0xff]   ;;  %v293_v21 = vld [vmem:[%s1694_s1 + $0x28] sm:$0xff]  ;;  %v292_v22 = vld [vmem:[%s1694_s1 + $0x20] sm:$0xff] }
   0x8   :  { %1185 = vmatprep.subr.bf16.mxu0 %v1314_v3  ;;  %311 = vperm.xlu0 %1310, %v289_v10   ;;  %v1319_v23 = vld [vmem:[%s1692_s2 + $0x38] sm:$0xff]   ;;  %v294_v26 = vld [vmem:[%s1694_s1 + $0x30] sm:$0xff]  ;;  %v42_v27 = vld [vmem:[%s1693_s0 + $0x8] sm:$0xff] }
   0x9   :  { %1213 = vmatprep.subr.bf16.mxu1 %v1320_v15  ;;  %v1323_v24 = vld [vmem:[%s1695_s3 + $0x58] sm:$0xff]   ;;  %v1324_v28 = vld [vmem:[%s1695_s3] sm:$0xff]   ;;  %v301_v30 = vld [vmem:[%s1694_s1 + $0x68] sm:$0xff]  ;;  %v47_v33 = vunpack.c.l.s8.bf16 %v42_v27  ;;  %v48_v42 = vunpack.c.h.s8.bf16 %v42_v27 }
   0xa   :  { %1214 = vmatpush3.bf16.msra.mxu1 %v1320_v15  ;;  %v295_v25 = vld [vmem:[%s1694_s1 + $0x38] sm:$0xff]  ;;  %v1325_v29 = vld [vmem:[%s1695_s3 + $0x60] sm:$0xff]   ;;  %v1326_v34 = vld [vmem:[%s1695_s3 + $0x8] sm:$0xff]  }
   0xb   :  { %1186 = vmatpush3.bf16.msra.mxu0 %v1314_v3  ;;  %351 = vperm.xlu1 %1311, %v297_v13   ;;  %v300_v32 = vld [vmem:[%s1694_s1 + $0x60] sm:$0xff]  ;;  %v1327_v35 = vld [vmem:[%s1695_s3 + $0x68] sm:$0xff]   ;;  %v303_v37 = vld [vmem:[%s1694_s1 + $0x78] sm:$0xff] }
   0xc   :  { %1187 = vmatprep.subr.bf16.mxu0 %v1315_v4  ;;  %346 = vperm.xlu0 %1310, %v296_v14   ;;  %v1332_v36 = vld [vmem:[%s1692_s2] sm:$0xff]   ;;  %v43_v38 = vld [vmem:[%s1693_s0 + $0x10] sm:$0xff]  ;;  %v1330_v44 = vld [vmem:[%s1695_s3 + $0x18] sm:$0xff]  }
   0xd   :  { %1215 = vmatprep.subr.bf16.mxu1 %v1321_v16  ;;  %v302_v39 = vld [vmem:[%s1694_s1 + $0x70] sm:$0xff]  ;;  %1229 = vmatprep.mubr.bf16.mxu1 %v1332_v36  ;;  %v49_v43 = vunpack.c.l.s8.bf16 %v43_v38  ;;  %v1331_v45 = vld [vmem:[%s1695_s3 + $0x78] sm:$0xff]   ;;  %v1333_v47 = vld [vmem:[%s1695_s3 + $0x20] sm:$0xff]   ;;  %v50_v48 = vunpack.c.h.s8.bf16 %v43_v38 }
   0xe   :  { %1216 = vmatpush3.bf16.msra.mxu1 %v1321_v16  ;;  %v1328_v40 = vld [vmem:[%s1695_s3 + $0x10] sm:$0xff]   ;;  %v44_v46 = vld [vmem:[%s1693_s0 + $0x18] sm:$0xff]  ;;  %v1334_v50 = vld [vmem:[%s1692_s2 + $0x8] sm:$0xff]  }
   0xf   :  { %1188 = vmatpush3.bf16.msra.mxu0 %v1315_v4  ;;  %361 = vperm.xlu1 %1311, %v299_v18   ;;  %v1329_v41 = vld [vmem:[%s1695_s3 + $0x70] sm:$0xff]   ;;  %v51_v49 = vunpack.c.l.s8.bf16 %v44_v46  ;;  %v1335_v51 = vld [vmem:[%s1695_s3 + $0x28] sm:$0xff]   ;;  %v52_v52 = vunpack.c.h.s8.bf16 %v44_v46  ;;  %v1338_v55 = vld [vmem:[%s1692_s2 + $0x18] sm:$0xff]  }
  0x10   :  { %1189 = vmatprep.subr.bf16.mxu0 %v1316_v11  ;;  %356 = vperm.xlu0 %1310, %v298_v19   ;;  %v1336_v53 = vld [vmem:[%s1692_s2 + $0x10] sm:$0xff]   ;;  %v1339_v56 = vld [vmem:[%s1695_s3 + $0x38] sm:$0xff]   ;;  %v1340_v57 = vld [vmem:[%s1692_s2 + $0x20] sm:$0xff]  }
  0x11   :  { %1217 = vmatprep.subr.bf16.mxu1 %v1322_v20  ;;  %v1337_v54 = vld [vmem:[%s1695_s3 + $0x30] sm:$0xff]   ;;  %v1341_v58 = vld [vmem:[%s1692_s2 + $0x28] sm:$0xff]   ;;  %v1343_v60 = vld [vmem:[%s1692_s2 + $0x38] sm:$0xff]  }
  0x12   :  { %1218 = vmatpush3.bf16.msra.mxu1 %v1322_v20  ;;  %v1342_v59 = vld [vmem:[%s1692_s2 + $0x30] sm:$0xff]  }
  0x13   :  { %1190 = vmatpush3.bf16.msra.mxu0 %v1316_v11  ;;  %331 = vperm.xlu1 %1311, %v293_v21  }
  0x14   :  { %1191 = vmatprep.subr.bf16.mxu0 %v1317_v12  ;;  %326 = vperm.xlu0 %1310, %v292_v22  }
  0x15   :  { %1219 = vmatprep.subr.bf16.mxu1 %v1323_v24 }
  0x16   :  { %1220 = vmatpush3.bf16.msra.mxu1 %v1323_v24 }
  0x17   :  { %1192 = vmatpush3.bf16.msra.mxu0 %v1317_v12  ;;  %341 = vperm.xlu1 %1311, %v295_v25  }
  0x18   :  { %1193 = vmatprep.subr.bf16.mxu0 %v1318_v17  ;;  %336 = vperm.xlu0 %1310, %v294_v26  }
  0x19   :  { %1221 = vmatprep.subr.bf16.mxu1 %v1325_v29 }
  0x1a   :  { %1222 = vmatpush3.bf16.msra.mxu1 %v1325_v29 }
  0x1b   :  { %1194 = vmatpush3.bf16.msra.mxu0 %v1318_v17  ;;  %371 = vperm.xlu1 %1311, %v301_v30  }
  0x1c   :  { %1195 = vmatprep.subr.bf16.mxu0 %v1319_v23  ;;  %366 = vperm.xlu0 %1310, %v300_v32  }
  0x1d   :  { %1223 = vmatprep.subr.bf16.mxu1 %v1327_v35 }
  0x1e   :  { %1224 = vmatpush3.bf16.msra.mxu1 %v1327_v35 }
  0x1f   :  { %1196 = vmatpush3.bf16.msra.mxu0 %v1319_v23  ;;  %381 = vperm.xlu1 %1311, %v303_v37  }
  0x20   :  { %1245 = vmatprep.subr.bf16.mxu0 %v1324_v28  ;;  %376 = vperm.xlu0 %1310, %v302_v39  }
  0x21   :  { %1225 = vmatprep.subr.bf16.mxu1 %v1329_v41 }
  0x22   :  { %1198 = vmatmul.mubr.bf16.vlgmr.msra.gmra.mrb[0].mxu0 %v46_v31  ;;  %1226 = vmatpush3.bf16.msra.mxu1 %v1329_v41 }
  0x23   :  { %1201 = vmatprep.mubr.bf16.mxu0 %v47_v33  ;;  %1246 = vmatpush3.bf16.msra.mxu0 %v1324_v28 }
  0x24   :  { %1247 = vmatprep.subr.bf16.mxu0 %v1326_v34  ;;  %1227 = vmatprep.subr.bf16.mxu1 %v1331_v45 }
  0x26   :  { %1228 = vmatpush3.bf16.msra.mxu1 %v1331_v45 }
  0x27   :  { %1248 = vmatpush3.bf16.msra.mxu0 %v1326_v34  ;;  %1277 = vmatprep.subr.bf16.mxu1 %v1324_v28 }
  0x28   :  { %1249 = vmatprep.subr.bf16.mxu0 %v1328_v40 }
  0x29   :  { %1230 = vmatmul.mubr.bf16.vlgmr.msra.gmra.mrb[0].mxu1 %v1334_v50 }
  0x2a   :  { %1202 = vmatmul.mubr.bf16.gmra.mrb[4].mxu0 %v48_v42  ;;  %1285 = vmatpush3.bf16.msra.mxu1 %v1324_v28 }
  0x2b   :  { %1205 = vmatprep.mubr.bf16.mxu0 %v49_v43  ;;  %1250 = vmatpush3.bf16.msra.mxu0 %v1328_v40 }
  0x2c   :  { %1251 = vmatprep.subr.bf16.mxu0 %v1330_v44  ;;  %1278 = vmatprep.subr.bf16.mxu1 %v1326_v34 }
  0x2d   :  { %1233 = vmatprep.mubr.bf16.mxu1 %v1336_v53 }
  0x2e   :  { %1286 = vmatpush3.bf16.msra.mxu1 %v1326_v34 }
  0x2f   :  { %1252 = vmatpush3.bf16.msra.mxu0 %v1330_v44  ;;  %1279 = vmatprep.subr.bf16.mxu1 %v1328_v40 }
  0x30   :  { %1253 = vmatprep.subr.bf16.mxu0 %v1333_v47 }
  0x31   :  { %1234 = vmatmul.mubr.bf16.gmra.mrb[4].mxu1 %v1338_v55 }
  0x32   :  { %1206 = vmatmul.mubr.bf16.gmra.mrb[8].mxu0 %v50_v48  ;;  %1287 = vmatpush3.bf16.msra.mxu1 %v1328_v40 }
  0x33   :  { %1209 = vmatprep.mubr.bf16.mxu0 %v51_v49  ;;  %1254 = vmatpush3.bf16.msra.mxu0 %v1333_v47 }
  0x34   :  { %1255 = vmatprep.subr.bf16.mxu0 %v1335_v51  ;;  %1280 = vmatprep.subr.bf16.mxu1 %v1330_v44 }
  0x35   :  { %1237 = vmatprep.mubr.bf16.mxu1 %v1340_v57 }
  0x36   :  { %1288 = vmatpush3.bf16.msra.mxu1 %v1330_v44 }
  0x37   :  { %1256 = vmatpush3.bf16.msra.mxu0 %v1335_v51  ;;  %1281 = vmatprep.subr.bf16.mxu1 %v1333_v47 }
  0x38   :  { %1257 = vmatprep.subr.bf16.mxu0 %v1337_v54 }
  0x39   :  { %1238 = vmatmul.mubr.bf16.gmra.mrb[8].mxu1 %v1341_v58 }
  0x3a   :  { %1210 = vmatmul.mubr.bf16.gmra.mrb[12].mxu0 %v52_v52  ;;  %1289 = vmatpush3.bf16.msra.mxu1 %v1333_v47 }
  0x3b   :  { %1282 = vmatprep.subr.bf16.mxu1 %v1335_v51  ;;  %1258 = vmatpush3.bf16.msra.mxu0 %v1337_v54 }
  0x3c   :  { %1259 = vmatprep.subr.bf16.mxu0 %v1339_v56  ;;  %1241 = vmatprep.mubr.bf16.mxu1 %v1342_v59 }
  0x3e   :  { %1290 = vmatpush3.bf16.msra.mxu1 %v1335_v51 }
  0x3f   :  { %1283 = vmatprep.subr.bf16.mxu1 %v1337_v54  ;;  %1260 = vmatpush3.bf16.msra.mxu0 %v1339_v56 }
  0x41   :  { %1242 = vmatmul.mubr.bf16.gmra.mrb[12].mxu1 %v1343_v60 }
  0x42   :  { %1291 = vmatpush3.bf16.msra.mxu1 %v1337_v54 }
  0x43   :  { %1284 = vmatprep.subr.bf16.mxu1 %v1339_v56 }
  0x46   :  { %1292 = vmatpush3.bf16.msra.mxu1 %v1339_v56 }
  0x82   :  { %v317_v61 = vpop.permute.xlu1 %316 }
  0x83   :  { %v307_v62 = vpop.permute.xlu0 %306 }
  0x86   :  { %v322_v63 = vpop.permute.xlu1 %321 }
  0x87   :  { %v312_v0 = vpop.permute.xlu0 %311 }
  0x8a   :  { %v352_v1 = vpop.permute.xlu1 %351 }
  0x8b   :  { %v347_v2 = vpop.permute.xlu0 %346 }
  0x8e   :  { %v362_v3 = vpop.permute.xlu1 %361 }
  0x8f   :  { %v357_v4 = vpop.permute.xlu0 %356 }
  0x92   :  { %v332_v8 = vpop.permute.xlu1 %331 }
  0x93   :  { %v327_v12 = vpop.permute.xlu0 %326 }
  0x96   :  { %v342_v18 = vpop.permute.xlu1 %341 }
  0x97   :  { %v337_v20 = vpop.permute.xlu0 %336 }
  0x9a   :  { %v372_v29 = vpop.permute.xlu1 %371 }
  0x9b   :  { %v367_v39 = vpop.permute.xlu0 %366 }
  0x9e   :  { %v382_v46 = vpop.permute.xlu1 %381 }
  0x9f   :  { %v377_v48 = vpop.permute.xlu0 %376 }
  0xf5   :  { %v1199_v5 = vpop.f32.mrb[0].mxu0 }
  0xf6   :  { %v172_v6 = vpop.f32.mrb[1].mxu0  ;;  %v386_v9 = vmul.f32 %v1199_v5, %v317_v61 }
  0xf7   :  { %v1200_v7 = vpop.f32.mrb[2].mxu0  ;;  %v384_v13 = vmul.f32 %v307_v62, %v172_v6  ;;  %v1570_v62 = vld [vmem:[%s1696_s4] ss:$0 sm:$0xff] }
  0xf8   :  { %v387_v10 = vmul.f32 %v1200_v7, %v322_v63  ;;  %v175_v11 = vpop.f32.mrb[3].mxu0 }
  0xf9   :  { %v385_v14 = vmul.f32 %v312_v0, %v175_v11 }
  0xfa   :  { %v421_v15 = vpack.c.bf16 %v387_v10, %v386_v9 }
  0xfb   :  { %v420_v16 = vpack.c.bf16 %v385_v14, %v384_v13 }
  0xfc   :  { %v1231_v32 = vpop.f32.mrb[0].mxu1 }
  0xfd   :  { %v1203_v17 = vpop.f32.mrb[4].mxu0  ;;  %1261 = vmatprep.mubr.bf16.mxu0 %v420_v16  ;;  %v590_v34 = vpop.f32.mrb[1].mxu1 }
  0xfe   :  { %v188_v19 = vpop.f32.mrb[5].mxu0  ;;  %1262 = vmatmul.mubr.bf16.vlgmr.msra.gmra.mrb[16].mxu0 %v421_v15  ;;  %v390_v22 = vmul.f32 %v1203_v17, %v337_v20  ;;  %v1232_v38 = vpop.f32.mrb[2].mxu1 }
  0xff   :  { %v1204_v21 = vpop.f32.mrb[6].mxu0  ;;  %v388_v25 = vmul.f32 %v327_v12, %v188_v19  ;;  %v593_v42 = vpop.f32.mrb[3].mxu1 }
 0x100   :  { %v391_v23 = vmul.f32 %v1204_v21, %v342_v18  ;;  %v191_v24 = vpop.f32.mrb[7].mxu0 }
 0x101   :  { %v389_v26 = vmul.f32 %v332_v8, %v191_v24 }
 0x102   :  { %v423_v27 = vpack.c.bf16 %v391_v23, %v390_v22 }
 0x103   :  { %v422_v28 = vpack.c.bf16 %v389_v26, %v388_v25 }
 0x104   :  { %v1235_v57 = vpop.f32.mrb[4].mxu1 }
 0x105   :  { %v1207_v30 = vpop.f32.mrb[8].mxu0  ;;  %1265 = vmatprep.mubr.bf16.mxu0 %v422_v28  ;;  %v606_v58 = vpop.f32.mrb[5].mxu1 }
 0x106   :  { %v204_v31 = vpop.f32.mrb[9].mxu0  ;;  %1266 = vmatmul.mubr.bf16.gmra.mrb[20].mxu0 %v423_v27  ;;  %v394_v35 = vmul.f32 %v1207_v30, %v357_v4  ;;  %v1236_v59 = vpop.f32.mrb[6].mxu1 }
 0x107   :  { %v1208_v33 = vpop.f32.mrb[10].mxu0  ;;  %v392_v40 = vmul.f32 %v347_v2, %v204_v31  ;;  %v609_v60 = vpop.f32.mrb[7].mxu1 }
 0x108   :  { %v395_v36 = vmul.f32 %v1208_v33, %v362_v3  ;;  %v207_v37 = vpop.f32.mrb[11].mxu0 }
 0x109   :  { %v393_v41 = vmul.f32 %v352_v1, %v207_v37 }
 0x10a   :  { %v425_v43 = vpack.c.bf16 %v395_v36, %v394_v35 }
 0x10b   :  { %v424_v44 = vpack.c.bf16 %v393_v41, %v392_v40 }
 0x10d   :  { %v1211_v45 = vpop.f32.mrb[12].mxu0  ;;  %1269 = vmatprep.mubr.bf16.mxu1 %v424_v44 }
 0x10e   :  { %v220_v47 = vpop.f32.mrb[13].mxu0  ;;  %1270 = vmatmul.mubr.bf16.vlgmr.msra.gmra.mrb[8].mxu1 %v425_v43  ;;  %v398_v50 = vmul.f32 %v1211_v45, %v377_v48 }
 0x10f   :  { %v1212_v49 = vpop.f32.mrb[14].mxu0  ;;  %v396_v53 = vmul.f32 %v367_v39, %v220_v47 }
 0x110   :  { %v399_v51 = vmul.f32 %v1212_v49, %v382_v46  ;;  %v223_v52 = vpop.f32.mrb[15].mxu0 }
 0x111   :  { %v397_v54 = vmul.f32 %v372_v29, %v223_v52 }
 0x112   :  { %v427_v55 = vpack.c.bf16 %v399_v51, %v398_v50 }
 0x113   :  { %v426_v56 = vpack.c.bf16 %v397_v54, %v396_v53 }
 0x115   :  { %1273 = vmatprep.mubr.bf16.mxu1 %v426_v56 }
 0x116   :  { %1274 = vmatmul.mubr.bf16.gmra.mrb[12].mxu1 %v427_v55 }
 0x1d1   :  { %v1263_v61 = vpop.f32.mrb[16].mxu0 }
 0x1d2   :  { %v744_v63 = vadd.f32 %v1263_v61, %v1231_v32  ;;  %v735_v0 = vpop.f32.mrb[17].mxu0 }
 0x1d3   :  { %v736_v1 = vadd.f32 %v735_v0, %v590_v34  ;;  %v1264_v2 = vpop.f32.mrb[18].mxu0 }
 0x1d4   :  { %v1573_v3 = vadd.f32 %v1570_v62, %v744_v63  ;;  %v747_v4 = vadd.f32 %v1264_v2, %v1232_v38  ;;  %v738_v5 = vpop.f32.mrb[19].mxu0 }
 0x1d5   :  { %v739_v6 = vadd.f32 %v738_v5, %v593_v42  ;;  %v1576_v7 = vadd.f32 %v1570_v62, %v736_v1 }
 0x1d6   :  { %v823_v8 = vmul.f32 %v1573_v3, %v1573_v3  ;;  %v1586_v12 = vadd.f32 %v1570_v62, %v747_v4 }
 0x1d7   :  { %v1581_v9 = vadd.f32 %v1570_v62, %v739_v6  ;;  %v821_v15 = vmul.f32 %v1576_v7, %v1576_v7 }
 0x1d8   :  { %841 = vadd.xlane.f32.xlu0 %v823_v8  ;;  %v824_v25 = vmul.f32 %v1586_v12, %v1586_v12 }
 0x1d9   :  { %v1267_v10 = vpop.f32.mrb[20].mxu0  ;;  %v822_v11 = vmul.f32 %v1581_v9, %v1581_v9 }
 0x1da   :  { %v760_v13 = vadd.f32 %v1267_v10, %v1235_v57  ;;  %v751_v14 = vpop.f32.mrb[21].mxu0 }
 0x1db   :  { %v752_v16 = vadd.f32 %v751_v14, %v606_v58  ;;  %v1268_v17 = vpop.f32.mrb[22].mxu0  ;;  %839 = vadd.xlane.f32.xlu1 %v822_v11 }
 0x1dc   :  { %v1591_v18 = vadd.f32 %v1570_v62, %v760_v13  ;;  %v763_v19 = vadd.f32 %v1268_v17, %v1236_v59  ;;  %v754_v20 = vpop.f32.mrb[23].mxu0  ;;  %837 = vadd.xlane.f32.xlu0 %v821_v15 }
 0x1dd   :  { %v755_v21 = vadd.f32 %v754_v20, %v609_v60  ;;  %v1594_v22 = vadd.f32 %v1570_v62, %v752_v16 }
 0x1de   :  { %v1597_v23 = vadd.f32 %v1570_v62, %v763_v19  ;;  %v827_v24 = vmul.f32 %v1591_v18, %v1591_v18 }
 0x1df   :  { %v1604_v27 = vadd.f32 %v1570_v62, %v755_v21  ;;  %v825_v30 = vmul.f32 %v1594_v22, %v1594_v22 }
 0x1e0   :  { %849 = vadd.xlane.f32.xlu1 %v827_v24  ;;  %843 = vadd.xlane.f32.xlu0 %v824_v25  ;;  %v828_v31 = vmul.f32 %v1597_v23, %v1597_v23 }
 0x1e1   :  { %v1271_v26 = vpop.f32.mrb[8].mxu1  ;;  %v826_v37 = vmul.f32 %v1604_v27, %v1604_v27 }
 0x1e2   :  { %v1607_v28 = vadd.f32 %v1271_v26, %v1570_v62  ;;  %v767_v29 = vpop.f32.mrb[9].mxu1 }
 0x1e3   :  { %v1272_v32 = vpop.f32.mrb[10].mxu1  ;;  %v1614_v34 = vadd.f32 %v1570_v62, %v767_v29 }
 0x1e4   :  { %v770_v33 = vpop.f32.mrb[11].mxu1  ;;  %845 = vadd.xlane.f32.xlu1 %v825_v30  ;;  %851 = vadd.xlane.f32.xlu0 %v828_v31  ;;  %v1617_v35 = vadd.f32 %v1272_v32, %v1570_v62  ;;  %v831_v36 = vmul.f32 %v1607_v28, %v1607_v28 }
 0x1e5   :  { %v1624_v39 = vadd.f32 %v1570_v62, %v770_v33  ;;  %v829_v41 = vmul.f32 %v1614_v34, %v1614_v34 }
 0x1e6   :  { %v832_v42 = vmul.f32 %v1617_v35, %v1617_v35 }
 0x1e7   :  { %v830_v49 = vmul.f32 %v1624_v39, %v1624_v39 }
 0x1e8   :  { %857 = vadd.xlane.f32.xlu1 %v831_v36  ;;  %847 = vadd.xlane.f32.xlu0 %v826_v37 }
 0x1e9   :  { %v1275_v38 = vpop.f32.mrb[12].mxu1 }
 0x1ea   :  { %v783_v40 = vpop.f32.mrb[13].mxu1  ;;  %v1636_v47 = vadd.f32 %v1275_v38, %v1570_v62 }
 0x1eb   :  { %v1631_v43 = vadd.f32 %v1570_v62, %v783_v40  ;;  %v1276_v44 = vpop.f32.mrb[14].mxu1 }
 0x1ec   :  { %853 = vadd.xlane.f32.xlu1 %v829_v41  ;;  %859 = vadd.xlane.f32.xlu0 %v832_v42  ;;  %v786_v45 = vpop.f32.mrb[15].mxu1  ;;  %v1644_v50 = vadd.f32 %v1276_v44, %v1570_v62  ;;  %v835_v51 = vmul.f32 %v1636_v47, %v1636_v47 }
 0x1ed   :  { %v833_v46 = vmul.f32 %v1631_v43, %v1631_v43  ;;  %v1639_v48 = vadd.f32 %v1570_v62, %v786_v45 }
 0x1ee   :  { %v836_v53 = vmul.f32 %v1644_v50, %v1644_v50 }
 0x1ef   :  { %v834_v52 = vmul.f32 %v1639_v48, %v1639_v48 }
 0x1f0   :  { %855 = vadd.xlane.f32.xlu0 %v830_v49  ;;  %861 = vadd.xlane.f32.xlu1 %v833_v46 }
 0x1f4   :  { %865 = vadd.xlane.f32.xlu1 %v835_v51  ;;  %863 = vadd.xlane.f32.xlu0 %v834_v52 }
 0x1f8   :  { %867 = vadd.xlane.f32.xlu0 %v836_v53 }
 0x265   :  { %v842_v54 = vpop.xlane.xlu0 %841 }
 0x266   :  { %v871_v56 = vmax.f32 %v842_v54, 1e-24 }
 0x268   :  { %v840_v55 = vpop.xlane.xlu1 %839 }
 0x269   :  { %v870_v57 = vmax.f32 %v840_v55, 1e-24  ;;  %v838_v58 = vpop.xlane.xlu0 %837 }
 0x26a   :  { %v869_v59 = vmax.f32 %v838_v58, 1e-24 }
 0x26b   :  { %1344 = vrsqrt.f32 %v870_v57 }
 0x26c   :  { %1346 = vrsqrt.f32 %v869_v59 }
 0x26d   :  { %1348 = vrsqrt.f32 %v871_v56  ;;  %v850_v60 = vpop.xlane.xlu1 %849  ;;  %v844_v61 = vpop.xlane.xlu0 %843 }
 0x26e   :  { %v875_v62 = vmax.f32 %v850_v60, 1e-24  ;;  %v872_v63 = vmax.f32 %v844_v61, 1e-24 }
 0x270   :  { %1350 = vrsqrt.f32 %v875_v62 }
 0x271   :  { %1352 = vrsqrt.f32 %v872_v63  ;;  %v846_v0 = vpop.xlane.xlu1 %845  ;;  %v852_v1 = vpop.xlane.xlu0 %851 }
 0x272   :  { %v873_v2 = vmax.f32 %v846_v0, 1e-24  ;;  %v876_v4 = vmax.f32 %v852_v1, 1e-24 }
 0x274   :  { %1354 = vrsqrt.f32 %v873_v2 }
 0x275   :  { %v1345_v5 = vpop.eup %1344  ;;  %1356 = vrsqrt.f32 %v876_v4  ;;  %v858_v6 = vpop.xlane.xlu1 %857 }
 0x276   :  { %v848_v8 = vpop.xlane.xlu0 %847  ;;  %v1347_v10 = vpop.eup %1346  ;;  %v902_v11 = vmul.f32 %v1345_v5, %v1581_v9  ;;  %v879_v13 = vmax.f32 %v858_v6, 1e-24 }
 0x277   :  { %v874_v14 = vmax.f32 %v848_v8, 1e-24  ;;  %v1349_v15 = vpop.eup %1348  ;;  %v901_v16 = vmul.f32 %v1347_v10, %v1576_v7 }
 0x278   :  { %v918_v17 = vmax.f32 %v902_v11, 0.0  ;;  %1358 = vrsqrt.f32 %v879_v13  ;;  %v903_v25 = vmul.f32 %v1349_v15, %v1573_v3 }
 0x279   :  { %v917_v19 = vmax.f32 %v901_v16, 0.0  ;;  %1360 = vrsqrt.f32 %v874_v14  ;;  %v854_v20 = vpop.xlane.xlu1 %853 }
 0x27a   :  { %v860_v21 = vpop.xlane.xlu0 %859  ;;  %v1351_v24 = vpop.eup %1350  ;;  %v877_v26 = vmax.f32 %v854_v20, 1e-24  ;;  %v919_v37 = vmax.f32 %v903_v25, 0.0 }
 0x27b   :  { %v880_v29 = vmax.f32 %v860_v21, 1e-24  ;;  %v1353_v30 = vpop.eup %1352  ;;  %v1089_v31 = vpack.c.bf16 %v918_v17, %v917_v19  ;;  %v907_v7 = vmul.f32 %v1351_v24, %v1591_v18 }
 0x27c   :  { %v904_v9 = vmul.f32 %v1353_v30, %v1586_v12  ;;  %1362 = vrsqrt.f32 %v877_v26 }
 0x27d   :  { %1090 = vst [vmem:[%s1697_s5] sm:$0xff] %v1089_v31   ;;  %1364 = vrsqrt.f32 %v880_v29  ;;  %v862_v33 = vpop.xlane.xlu1 %861  ;;  %v923_v12 = vmax.f32 %v907_v7, 0.0 }
 0x27e   :  { %v856_v32 = vpop.xlane.xlu0 %855  ;;  %v1355_v36 = vpop.eup %1354  ;;  %v920_v38 = vmax.f32 %v904_v9, 0.0  ;;  %v881_v40 = vmax.f32 %v862_v33, 1e-24 }
 0x27f   :  { %v878_v3 = vmax.f32 %v856_v32, 1e-24  ;;  %v1357_v41 = vpop.eup %1356  ;;  %v905_v18 = vmul.f32 %v1355_v36, %v1594_v22 }
 0x280   :  { %v1094_v42 = vpack.c.bf16 %v920_v38, %v919_v37  ;;  %v908_v44 = vmul.f32 %v1357_v41, %v1597_v23 }
 0x281   :  { %1366 = vrsqrt.f32 %v878_v3  ;;  %v866_v45 = vpop.xlane.xlu1 %865  ;;  %v921_v58 = vmax.f32 %v905_v18, 0.0 }
 0x282   :  { %1368 = vrsqrt.f32 %v881_v40  ;;  %v864_v46 = vpop.xlane.xlu0 %863  ;;  %v1359_v49 = vpop.eup %1358  ;;  %1126 = vst [vmem:[%s1697_s5 + $0x8] sm:$0xff] %v1094_v42   ;;  %v924_v51 = vmax.f32 %v908_v44, 0.0  ;;  %v883_v52 = vmax.f32 %v866_v45, 1e-24 }
 0x283   :  { %v882_v53 = vmax.f32 %v864_v46, 1e-24  ;;  %v1361_v54 = vpop.eup %1360  ;;  %v911_v59 = vmul.f32 %v1359_v49, %v1607_v28 }
 0x284   :  { %v1104_v55 = vpack.c.bf16 %v924_v51, %v923_v12  ;;  %v906_v56 = vmul.f32 %v1361_v54, %v1604_v27  ;;  %1370 = vrsqrt.f32 %v883_v52 }
 0x285   :  { %1372 = vrsqrt.f32 %v882_v53  ;;  %v927_v1 = vmax.f32 %v911_v59, 0.0 }
 0x286   :  { %v868_v23 = vpop.xlane.xlu0 %867  ;;  %v1363_v57 = vpop.eup %1362  ;;  %1128 = vst [vmem:[%s1697_s5 + $0x18] sm:$0xff] %v1104_v55   ;;  %v922_v60 = vmax.f32 %v906_v56, 0.0 }
 0x287   :  { %v884_v22 = vmax.f32 %v868_v23, 1e-24  ;;  %v1365_v61 = vpop.eup %1364  ;;  %v909_v27 = vmul.f32 %v1363_v57, %v1614_v34 }
 0x288   :  { %v1099_v62 = vpack.c.bf16 %v922_v60, %v921_v58  ;;  %v912_v63 = vmul.f32 %v1365_v61, %v1617_v35 }
 0x289   :  { %1374 = vrsqrt.f32 %v884_v22  ;;  %v925_v6 = vmax.f32 %v909_v27, 0.0 }
 0x28a   :  { %1127 = vst [vmem:[%s1697_s5 + $0x10] sm:$0xff] %v1099_v62   ;;  %v928_v2 = vmax.f32 %v912_v63, 0.0 }
 0x28b   :  { %v1367_v0 = vpop.eup %1366 }
 0x28c   :  { %v1369_v4 = vpop.eup %1368  ;;  %v910_v5 = vmul.f32 %v1367_v0, %v1624_v39  ;;  %v1114_v28 = vpack.c.bf16 %v928_v2, %v927_v1 }
 0x28d   :  { %v913_v34 = vmul.f32 %v1369_v4, %v1631_v43 }
 0x28e   :  { %v926_v8 = vmax.f32 %v910_v5, 0.0  ;;  %v1371_v10 = vpop.eup %1370  ;;  %1130 = vst [vmem:[%s1697_s5 + $0x28] sm:$0xff] %v1114_v28  }
 0x28f   :  { %v1373_v35 = vpop.eup %1372  ;;  %v915_v39 = vmul.f32 %v1371_v10, %v1636_v47  ;;  %v929_v15 = vmax.f32 %v913_v34, 0.0 }
 0x290   :  { %v1109_v11 = vpack.c.bf16 %v926_v8, %v925_v6  ;;  %v914_v13 = vmul.f32 %v1373_v35, %v1639_v48 }
 0x291   :  { %v931_v20 = vmax.f32 %v915_v39, 0.0 }
 0x292   :  { %1129 = vst [vmem:[%s1697_s5 + $0x20] sm:$0xff] %v1109_v11   ;;  %v930_v16 = vmax.f32 %v914_v13, 0.0 }
 0x293   :  { %v1375_v14 = vpop.eup %1374 }
 0x294   :  { %v916_v17 = vmul.f32 %v1375_v14, %v1644_v50  ;;  %v1119_v19 = vpack.c.bf16 %v930_v16, %v929_v15 }
 0x296   :  { %v932_v21 = vmax.f32 %v916_v17, 0.0  ;;  %1131 = vst [vmem:[%s1697_s5 + $0x30] sm:$0xff] %v1119_v19  }
 0x298   :  { %v1124_v43 = vpack.c.bf16 %v932_v21, %v931_v20 }
 0x29a   :  { %1132 = vst [vmem:[%s1697_s5 + $0x38] sm:$0xff] %v1124_v43  }

</bundles_post_ra>
